<compile_context>
chip_gen: v6e
topology: v6e:2x2x1
jax: 0.10.0
libtpu: 0.0.40
codegen_flags: <defaults>
</compile_context>

<pallas_src>
import functools

import jax
import jax.numpy as jnp
from jax.experimental import pallas as pl
from jax.experimental.pallas import tpu as pltpu


_TEMPERATURE = 0.07
_PAD_LABEL = 1.0e6          # label pad value; guarantees dist >= thres on pad columns
_NEG_BIG = -1.0e30          # LSE mask value; exp() underflows to exactly 0


def _round_up(x, m):
    return ((x + m - 1) // m) * m


def _vmem_capacity_bytes():
    try:
        cap = getattr(pltpu.get_tpu_info(), "vmem_capacity_bytes", None)
        if cap:
            return int(cap)
    except Exception:
        pass
    return 64 * 2 ** 20      # conservative fallback (v7x per-TC)


def _moco_kernel(q_ref, k_ref, qk_t_ref, label_ref, qlab_t_ref,
                 stats_ref, l_other_ref,
                 m_scr, l_scr, wsum_scr, msum_scr, beat_scr, self_scr,
                 *, k_real, thres, action_mask, inv_temp, nk, needs_mask,
                 dist_dtype):
    split = pl.program_id(0)            # 0 -> instance mask, 1 -> action mask
    kidx = pl.program_id(1)             # queue-tile index (reduction axis, last)

    n = q_ref.shape[0]
    s_len = label_ref.shape[1]
    tile_k = qk_t_ref.shape[1]

    # ---- per-split init; the self column is folded in analytically ----------
    @pl.when(kidx == 0)
    def _init():
        qv = q_ref[...].astype(jnp.float32)       # bf16 products are exact in f32
        kv = k_ref[...].astype(jnp.float32)
        scaled_self = jnp.sum(qv * kv, axis=1, keepdims=True) * inv_temp
        self_scr[...] = scaled_self
        m_scr[...] = scaled_self                  # running max (self included)
        l_scr[...] = jnp.ones_like(scaled_self)   # exp(scaled_self - m) == 1
        wsum_scr[...] = scaled_self               # mask[:, 0] == 1 for both splits
        msum_scr[...] = jnp.ones_like(scaled_self)
        beat_scr[...] = jnp.zeros_like(scaled_self)

    # ---- queue-tile logits on the MXU (bf16 inputs, f32 accumulate) ---------
    lo = jnp.dot(q_ref[...], qk_t_ref[...],
                 preferred_element_type=jnp.float32)          # (N, tile_k)
    scaled = lo * inv_temp

    # raw queue logits out (re-used by the no-grad top-k metric in the wrapper)
    l_other_ref[...] = lo.astype(l_other_ref.dtype)

    def _accumulate(scaled_eff):
        # streaming log-sum-exp over self + queue columns
        tile_max = jnp.max(scaled_eff, axis=1, keepdims=True)
        m_new = jnp.maximum(m_scr[...], tile_max)
        alpha = jnp.exp(m_scr[...] - m_new)
        p = jnp.exp(scaled_eff - m_new)           # pad columns underflow to 0
        l_scr[...] = alpha * l_scr[...] + jnp.sum(p, axis=1, keepdims=True)
        m_scr[...] = m_new

        # split 0: instance mask is one-hot(col 0); only a strict beat-count
        # is needed for acc@1 / acc@5 (pad columns are -1e30 -> never beat).
        @pl.when(split == 0)
        def _instance():
            beats = (scaled_eff > self_scr[...]).astype(jnp.float32)
            beat_scr[...] += jnp.sum(beats, axis=1, keepdims=True)

        # split 1: action mask from label distances (K on lanes, static S-loop).
        # Pad columns of queue_label are _PAD_LABEL -> dist >> thres -> mask 0,
        # so no validity mask is needed here at all.
        @pl.when(split == 1)
        def _action():
            lab = label_ref[...].astype(dist_dtype)           # (N, S)
            qlt = qlab_t_ref[...].astype(dist_dtype)          # (S, tile_k)
            dist = jnp.zeros((n, tile_k), dist_dtype)
            for s in range(s_len):                            # static, small
                d = jnp.abs(lab[:, s:s + 1] - qlt[s:s + 1, :])
                if action_mask == "1norm":
                    dist = dist + d
                else:                                         # "infnorm"
                    dist = jnp.maximum(dist, d)
            mask_o = (dist.astype(jnp.float32) < thres).astype(jnp.float32)
            wsum_scr[...] += jnp.sum(mask_o * scaled, axis=1, keepdims=True)
            msum_scr[...] += jnp.sum(mask_o, axis=1, keepdims=True)

    if needs_mask:
        # Only the last tile contains K-padding -> interior tiles skip all
        # iota / compare / select work.
        n_valid_last = k_real - (nk - 1) * tile_k             # static, >= 1

        @pl.when(kidx == nk - 1)
        def _last_tile():
            col = jax.lax.broadcasted_iota(jnp.int32, (n, tile_k), 1)
            _accumulate(jnp.where(col < n_valid_last, scaled, _NEG_BIG))

        @pl.when(kidx < nk - 1)
        def _interior_tile():
            _accumulate(scaled)
    else:
        _accumulate(scaled)

    # ---- finalize: loss + split-0 acc, packed into one lane-dense store -----
    @pl.when(kidx == nk - 1)
    def _finalize():
        lse = m_scr[...] + jnp.log(l_scr[...])                # (N, 1)
        per_row = lse - wsum_scr[...] / msum_scr[...]         # -e_n
        inv_n = 1.0 / n
        loss = jnp.sum(per_row, axis=0, keepdims=True) * inv_n
        acc1 = jnp.sum((beat_scr[...] < 1.0).astype(jnp.float32),
                       axis=0, keepdims=True) * inv_n
        acc5 = jnp.sum((beat_scr[...] < 5.0).astype(jnp.float32),
                       axis=0, keepdims=True) * inv_n
        lane = jax.lax.broadcasted_iota(jnp.int32, (8, 128), 1)
        row0 = jax.lax.broadcasted_iota(jnp.int32, (8, 128), 0) == 0
        packed = (jnp.where(jnp.logical_and(row0, lane == 0), loss, 0.0)
                  + jnp.where(jnp.logical_and(row0, lane == 1), acc1, 0.0)
                  + jnp.where(jnp.logical_and(row0, lane == 2), acc5, 0.0))
        stats_ref[...] = packed


def seq_label_moco_loss(q, k, label, queue_k, queue_label, *,
                        channel, thres, action_mask="1norm",
                        temperature=_TEMPERATURE, max_tile_k=8192,
                        compute_dtype=jnp.bfloat16,
                        distance_dtype=jnp.float32,
                        logits_out_dtype=jnp.bfloat16):
    """Returns (loss_list[2], acc1[2], acc5[2]) like SeqLabelMoCoLoss.forward.

    compute_dtype:  dtype streamed through the MXU (bf16 recommended on TPU).
    distance_dtype: dtype of the split-1 label-distance loop; set to
                    jnp.bfloat16 on v6e/v7x to roughly halve the VALU-bound
                    distance work (can flip borderline `dist < thres` columns).
    """
    n, total_channel = q.shape
    k_real = queue_k.shape[0]
    s_len = label.shape[1]
    assert total_channel % channel == 0 and total_channel // channel >= 2
    assert channel % 128 == 0, "channel must be lane-aligned (multiple of 128)"
    if action_mask not in ("1norm", "infnorm"):
        raise NotImplementedError(action_mask)

    f32 = jnp.float32
    c_item = jnp.dtype(compute_dtype).itemsize
    d_item = jnp.dtype(distance_dtype).itemsize
    o_item = jnp.dtype(logits_out_dtype).itemsize

    # ---- VMEM-aware K tiling (real double-buffered footprint) ---------------
    vmem_cap = _vmem_capacity_bytes()
    vmem_budget = int(vmem_cap * 0.75)

    def footprint(tk):
        per_tile = (tk * channel * c_item            # queue_k^T tile
                    + s_len * tk * d_item            # queue_label^T tile
                    + n * tk * o_item                # l_other tile
                    + 8 * 128 * 4                    # stats tile
                    + 2 * n * channel * c_item       # q and k split blocks
                    + n * s_len * d_item)            # label block
        scratch = 6 * _round_up(max(n, 8), 8) * 128 * 4
        return 2 * per_tile + scratch                # x2: double buffering

    k_pad128 = _round_up(max(k_real, 128), 128)
    tile_k = min(_round_up(max_tile_k, 128), k_pad128)
    while tile_k > 128 and footprint(tile_k) > int(0.85 * vmem_budget):
        tile_k = max(128, _round_up(tile_k // 2, 128))
    nk = -(-k_pad128 // tile_k)
    tile_k = _round_up(-(-k_pad128 // nk), 128)
    k_pad = nk * tile_k
    needs_mask = k_pad > k_real
    vmem_limit = int(min(vmem_cap - (2 << 20),
                         max(vmem_budget, footprint(tile_k) + (2 << 20))))

    # ---- operand preparation (bf16 MXU stream, pre-transposed queue) --------
    q_c = q.astype(compute_dtype)
    k_c = k.astype(compute_dtype)
    queue_k_t = jnp.pad(queue_k.astype(compute_dtype),
                        ((0, k_pad - k_real), (0, 0))).T          # (C_total, Kpad)
    # Pad labels with a huge value so padded columns always fail `dist < thres`.
    queue_label_t = jnp.pad(queue_label.astype(distance_dtype),
                            ((0, k_pad - k_real), (0, 0)),
                            constant_values=_PAD_LABEL).T          # (S, Kpad)
    label_d = label.astype(distance_dtype)

    kernel = functools.partial(
        _moco_kernel, k_real=k_real, thres=float(thres),
        action_mask=action_mask, inv_temp=float(1.0 / temperature),
        nk=nk, needs_mask=needs_mask, dist_dtype=distance_dtype)

    out_shape = (jax.ShapeDtypeStruct((16, 128), f32),                 # packed scalars
                 jax.ShapeDtypeStruct((2, n, k_pad), logits_out_dtype))  # queue logits

    in_specs = [
        pl.BlockSpec((n, channel), lambda s, kk: (0, s)),            # q split
        pl.BlockSpec((n, channel), lambda s, kk: (0, s)),            # k split
        pl.BlockSpec((channel, tile_k), lambda s, kk: (s, kk)),      # queue_k^T tile
        pl.BlockSpec((n, s_len), lambda s, kk: (0, 0)),              # label
        pl.BlockSpec((s_len, tile_k), lambda s, kk: (0, kk)),        # queue_label^T tile
    ]
    out_specs = (
        pl.BlockSpec((8, 128), lambda s, kk: (s, 0)),                # per-split stats
        pl.BlockSpec((None, n, tile_k), lambda s, kk: (s, 0, kk)),   # queue logits
    )
    scratch_shapes = [pltpu.VMEM((n, 1), f32) for _ in range(6)]

    stats, l_other = pl.pallas_call(
        kernel,
        out_shape=out_shape,
        grid_spec=pltpu.PrefetchScalarGridSpec(
            num_scalar_prefetch=0,
            grid=(2, nk),
            in_specs=in_specs,
            out_specs=out_specs,
            scratch_shapes=scratch_shapes),
        compiler_params=pltpu.CompilerParams(
            dimension_semantics=("parallel", "arbitrary"),
            vmem_limit_bytes=vmem_limit),
    )(q_c, k_c, queue_k_t, label_d, queue_label_t)

    loss0, acc1_0, acc5_0 = stats[0, 0], stats[0, 1], stats[0, 2]
    loss1 = stats[8, 0]

    # ---- split-1 acc@k metric (no-grad) --------------------------------------
    # TODO(synk): torch.topk-style selection over the full (1+K)-column row has
    # no clean streaming Pallas equivalent; it is computed as a small no-grad
    # JAX epilogue on the bf16 queue logits the kernel already produced (one
    # shared descending sort per row feeds both top-k thresholds).
    q1 = q_c[:, channel:2 * channel].astype(f32)
    k1 = k_c[:, channel:2 * channel].astype(f32)
    l_self1 = jnp.sum(q1 * k1, axis=1, keepdims=True)
    logits1 = jnp.concatenate([l_self1, l_other[1, :, :k_real].astype(f32)], axis=1)

    lab_f = label.astype(f32)
    qlab_f = queue_label.astype(f32)
    dist = jnp.zeros((n, k_real), f32)
    for s in range(s_len):                       # static S-loop: no (N,K,S) blowup
        d = jnp.abs(lab_f[:, s:s + 1] - qlab_f[:, s][None, :])
        dist = dist + d if action_mask == "1norm" else jnp.maximum(dist, d)
    mask1 = jnp.concatenate(
        [jnp.ones((n, 1), f32), (dist < thres).astype(f32)], axis=1)

    m_cols = 1 + k_real
    sorted_desc = -jnp.sort(-logits1, axis=1)    # one sort shared by both k's
    mask1_sum = jnp.sum(mask1)

    def _member_acc(ntop):
        if ntop <= 0:
            return jnp.float32(0.0)              # torch.topk(k=0) selects nothing
        thr = sorted_desc[:, ntop - 1:ntop]
        in_top = (logits1 >= thr).astype(f32)
        return jnp.sum(in_top * mask1) / mask1_sum

    acc1_1 = _member_acc(m_cols // 10)
    acc5_1 = _member_acc(m_cols // 2)

    return [loss0, loss1], [acc1_0, acc1_1], [acc5_0, acc5_1]


def _topk_acc(logits, mask, ntop):
    # Row-wise top-`ntop` membership (exact for distinct logits, like torch.topk).
    if ntop <= 0:
        return jnp.float32(0.0)
    thr = jax.lax.top_k(logits, ntop)[0][:, -1:]
    in_top = (logits >= thr).astype(jnp.float32)
    return jnp.sum(in_top * mask) / jnp.sum(mask)


def _reference_forward(q, k, label, queue_k, queue_label, channel, thres,
                       action_mask="1norm", temperature=_TEMPERATURE):
    """Pure-JAX port of SeqLabelMoCoLoss.forward for validation."""
    n = q.shape[0]
    kq = queue_k.shape[0]
    diff = label[:, None, :] - queue_label[None, :, :]
    if action_mask == "1norm":
        dist = jnp.sum(jnp.abs(diff), axis=-1)
    else:
        dist = jnp.max(jnp.abs(diff), axis=-1)
    mask_action = jnp.concatenate(
        [jnp.ones((n, 1)), (dist < thres).astype(jnp.float32)], axis=1)
    mask_instance = jnp.broadcast_to(
        (jnp.arange(1 + kq)[None, :] == 0).astype(jnp.float32), (n, 1 + kq))
    losses, acc1s, acc5s = [], [], []
    for i in range(2):
        qi = q[:, i * channel:(i + 1) * channel]
        ki = k[:, i * channel:(i + 1) * channel]
        qki = queue_k[:, i * channel:(i + 1) * channel]
        l_self = jnp.sum(qi * ki, axis=1, keepdims=True)
        l_other = jnp.einsum('nc,kc->nk', qi, qki,
                             precision=jax.lax.Precision.HIGHEST)
        logits = jnp.concatenate([l_self, l_other], axis=1)
        mask = mask_instance if i == 0 else mask_action
        m_cols = logits.shape[1]
        ntop1 = 1 if i == 0 else m_cols // 10
        ntop5 = 5 if i == 0 else m_cols // 2
        acc1s.append(_topk_acc(logits, mask, ntop1))
        acc5s.append(_topk_acc(logits, mask, ntop5))
        lsm = jax.nn.log_softmax(logits / temperature, axis=1)
        e = jnp.sum(mask * lsm, axis=1) / jnp.sum(mask, axis=1)
        losses.append(jnp.mean(-e))
    return losses, acc1s, acc5s


if __name__ == "__main__":
    # Small shapes consistent with the module's forward:
    #   N=8 samples, T=2 splits of channel=128 -> total_channel=256,
    #   queue size K=32, label sequence length S=8.
    N, channel, T, K, S = 8, 128, 2, 32, 8
    thres = 9.0

    key = jax.random.PRNGKey(0)
    kq_, kk_, kqk_, kl_, kql_ = jax.random.split(key, 5)
    q = jax.random.normal(kq_, (N, T * channel), jnp.float32)
    k = jax.random.normal(kk_, (N, T * channel), jnp.float32)
    queue_k = jax.random.normal(kqk_, (K, T * channel), jnp.float32)
    label = jax.random.normal(kl_, (N, S), jnp.float32)
    queue_label = jax.random.normal(kql_, (K, S), jnp.float32)

    loss_list, acc1, acc5 = seq_label_moco_loss(
        q, k, label, queue_k, queue_label,
        channel=channel, thres=thres, action_mask="1norm")
    jax.block_until_ready(loss_list + acc1 + acc5)

    # Reference on bf16-rounded q/k/queue_k (the kernel streams them through the
    # MXU in bf16 with f32 accumulation, so this is the apples-to-apples check).
    br = lambda x: x.astype(jnp.bfloat16).astype(jnp.float32)
    ref_loss, ref_acc1, ref_acc5 = _reference_forward(
        br(q), br(k), label, br(queue_k), queue_label, channel, thres, "1norm")

    for got, want in zip(loss_list, ref_loss):
        g, w = float(got), float(want)
        assert abs(g - w) < 1e-2 + 1e-3 * abs(w), (g, w)
    # split-0 accs come straight from the kernel's f32 beat counts.
    for got, want in zip([acc1[0], acc5[0]], [ref_acc1[0], ref_acc5[0]]):
        assert abs(float(got) - float(want)) < 1e-3, (float(got), float(want))
    # split-1 accs go through the bf16 l_other store; allow a near-tie flip.
    for got, want in zip([acc1[1], acc5[1]], [ref_acc1[1], ref_acc5[1]]):
        assert abs(float(got) - float(want)) < 2e-2, (float(got), float(want))

    print("KERNEL_OK")
</pallas_src>

<mosaic_0001>
module attributes {stable_mosaic.version = 11 : i64} {
  func.func @_moco_kernel(%arg0: i32, %arg1: i32, %arg2: memref<8x128xbf16, #tpu.memory_space<vmem>>, %arg3: memref<8x128xbf16, #tpu.memory_space<vmem>>, %arg4: memref<128x128xbf16, #tpu.memory_space<vmem>>, %arg5: memref<8x8xf32, #tpu.memory_space<vmem>>, %arg6: memref<8x128xf32, #tpu.memory_space<vmem>>, %arg7: memref<8x128xf32, #tpu.memory_space<vmem>>, %arg8: memref<1x8x128xbf16, #tpu.memory_space<vmem>>, %arg9: memref<8x1xf32, #tpu.memory_space<vmem>>, %arg10: memref<8x1xf32, #tpu.memory_space<vmem>>, %arg11: memref<8x1xf32, #tpu.memory_space<vmem>>, %arg12: memref<8x1xf32, #tpu.memory_space<vmem>>, %arg13: memref<8x1xf32, #tpu.memory_space<vmem>>, %arg14: memref<8x1xf32, #tpu.memory_space<vmem>>) attributes {dimension_semantics = [#tpu.dimension_semantics<parallel>, #tpu.dimension_semantics<arbitrary>], iteration_bounds = array<i64: 2, 1>, scalar_prefetch = 0 : i64, scratch_operands = 6 : i64, tpu.core_type = #tpu.core_type<tc>, window_params = [{transform_indices = @transform_0, window_bounds = array<i64: 8, 128>}, {transform_indices = @transform_1, window_bounds = array<i64: 8, 128>}, {transform_indices = @transform_2, window_bounds = array<i64: 128, 128>}, {pipeline_mode = #tpu.pipeline_mode<synchronous>, transform_indices = @transform_3, window_bounds = array<i64: 8, 8>}, {transform_indices = @transform_4, window_bounds = array<i64: 8, 128>}, {transform_indices = @transform_5, window_bounds = array<i64: 8, 128>}, {transform_indices = @transform_6, window_bounds = array<i64: 1, 8, 128>}]} {
    %c0_i32 = arith.constant 0 : i32
    %0 = arith.cmpi eq, %arg1, %c0_i32 : i32
    %1 = arith.extui %0 : i1 to i32
    %c0_i32_0 = arith.constant 0 : i32
    %2 = arith.cmpi ne, %1, %c0_i32_0 : i32
    scf.if %2 {
      %c0_14 = arith.constant 0 : index
      %c0_15 = arith.constant 0 : index
      %21 = vector.load %arg2[%c0_14, %c0_15] : memref<8x128xbf16, #tpu.memory_space<vmem>>, vector<8x128xbf16>
      %22 = arith.extf %21 : vector<8x128xbf16> to vector<8x128xf32>
      %c0_16 = arith.constant 0 : index
      %c0_17 = arith.constant 0 : index
      %23 = vector.load %arg3[%c0_16, %c0_17] : memref<8x128xbf16, #tpu.memory_space<vmem>>, vector<8x128xbf16>
      %24 = arith.extf %23 : vector<8x128xbf16> to vector<8x128xf32>
      %25 = arith.mulf %22, %24 : vector<8x128xf32>
      %cst_18 = arith.constant dense<0.000000e+00> : vector<8xf32>
      %26 = vector.multi_reduction <add>, %25, %cst_18 [1] : vector<8x128xf32> to vector<8xf32>
      %27 = vector.shape_cast %26 : vector<8xf32> to vector<8x1xf32>
      %cst_19 = arith.constant 14.2857141 : f32
      %28 = vector.broadcast %cst_19 : f32 to vector<8x1xf32>
      %29 = arith.mulf %27, %28 : vector<8x1xf32>
      %c0_20 = arith.constant 0 : index
      %c0_21 = arith.constant 0 : index
      %30 = vector.load %arg14[%c0_20, %c0_21] : memref<8x1xf32, #tpu.memory_space<vmem>>, vector<8x1xf32>
      tpu.vector_store %arg14[%c0_20, %c0_21], %29 {strides = array<i32>} : memref<8x1xf32, #tpu.memory_space<vmem>>, vector<8x1xf32>,
      %c0_22 = arith.constant 0 : index
      %c0_23 = arith.constant 0 : index
      %31 = vector.load %arg9[%c0_22, %c0_23] : memref<8x1xf32, #tpu.memory_space<vmem>>, vector<8x1xf32>
      tpu.vector_store %arg9[%c0_22, %c0_23], %29 {strides = array<i32>} : memref<8x1xf32, #tpu.memory_space<vmem>>, vector<8x1xf32>,
      %cst_24 = arith.constant 1.000000e+00 : f32
      %32 = vector.broadcast %cst_24 : f32 to vector<8x1xf32>
      %c0_25 = arith.constant 0 : index
      %c0_26 = arith.constant 0 : index
      %33 = vector.load %arg10[%c0_25, %c0_26] : memref<8x1xf32, #tpu.memory_space<vmem>>, vector<8x1xf32>
      tpu.vector_store %arg10[%c0_25, %c0_26], %32 {strides = array<i32>} : memref<8x1xf32, #tpu.memory_space<vmem>>, vector<8x1xf32>,
      %c0_27 = arith.constant 0 : index
      %c0_28 = arith.constant 0 : index
      %34 = vector.load %arg11[%c0_27, %c0_28] : memref<8x1xf32, #tpu.memory_space<vmem>>, vector<8x1xf32>
      tpu.vector_store %arg11[%c0_27, %c0_28], %29 {strides = array<i32>} : memref<8x1xf32, #tpu.memory_space<vmem>>, vector<8x1xf32>,
      %cst_29 = arith.constant 1.000000e+00 : f32
      %35 = vector.broadcast %cst_29 : f32 to vector<8x1xf32>
      %c0_30 = arith.constant 0 : index
      %c0_31 = arith.constant 0 : index
      %36 = vector.load %arg12[%c0_30, %c0_31] : memref<8x1xf32, #tpu.memory_space<vmem>>, vector<8x1xf32>
      tpu.vector_store %arg12[%c0_30, %c0_31], %35 {strides = array<i32>} : memref<8x1xf32, #tpu.memory_space<vmem>>, vector<8x1xf32>,
      %cst_32 = arith.constant 0.000000e+00 : f32
      %37 = vector.broadcast %cst_32 : f32 to vector<8x1xf32>
      %c0_33 = arith.constant 0 : index
      %c0_34 = arith.constant 0 : index
      %38 = vector.load %arg13[%c0_33, %c0_34] : memref<8x1xf32, #tpu.memory_space<vmem>>, vector<8x1xf32>
      tpu.vector_store %arg13[%c0_33, %c0_34], %37 {strides = array<i32>} : memref<8x1xf32, #tpu.memory_space<vmem>>, vector<8x1xf32>,
    } else {
    }
    %c0 = arith.constant 0 : index
    %c0_1 = arith.constant 0 : index
    %3 = vector.load %arg2[%c0, %c0_1] : memref<8x128xbf16, #tpu.memory_space<vmem>>, vector<8x128xbf16>
    %c0_2 = arith.constant 0 : index
    %c0_3 = arith.constant 0 : index
    %4 = vector.load %arg4[%c0_2, %c0_3] : memref<128x128xbf16, #tpu.memory_space<vmem>>, vector<128x128xbf16>
    %cst = arith.constant dense<0.000000e+00> : vector<8x128xf32>
    %5 = tpu.matmul %3, %4, %cst {dimension_numbers = #tpu.dot_dimension_numbers<[1], [0], [0], [1], [0, 0, 1, 1], [], []>} : vector<8x128xbf16>, vector<128x128xbf16>, vector<8x128xf32> -> vector<8x128xf32>
    %cst_4 = arith.constant 14.2857141 : f32
    %6 = vector.broadcast %cst_4 : f32 to vector<8x128xf32>
    %7 = arith.mulf %5, %6 : vector<8x128xf32>
    %8 = arith.truncf %5 : vector<8x128xf32> to vector<8x128xbf16>
    %c0_5 = arith.constant 0 : index
    %c0_6 = arith.constant 0 : index
    %c0_7 = arith.constant 0 : index
    %9 = vector.load %arg8[%c0_5, %c0_6, %c0_7] : memref<1x8x128xbf16, #tpu.memory_space<vmem>>, vector<1x8x128xbf16>
    %10 = vector.shape_cast %9 : vector<1x8x128xbf16> to vector<8x128xbf16>
    %11 = vector.shape_cast %8 : vector<8x128xbf16> to vector<1x8x128xbf16>
    tpu.vector_store %arg8[%c0_5, %c0_6, %c0_7], %11 {strides = array<i32>} : memref<1x8x128xbf16, #tpu.memory_space<vmem>>, vector<1x8x128xbf16>,
    %c0_i32_8 = arith.constant 0 : i32
    %12 = arith.cmpi eq, %arg1, %c0_i32_8 : i32
    %13 = arith.extui %12 : i1 to i32
    %c0_i32_9 = arith.constant 0 : i32
    %14 = arith.cmpi ne, %13, %c0_i32_9 : i32
    scf.if %14 {
      %21 = tpu.iota {dimensions = array<i32: 1>} : vector<8x128xi32>
      %c32_i32 = arith.constant 32 : i32
      %22 = vector.broadcast %c32_i32 : i32 to vector<8x128xi32>
      %23 = arith.cmpi slt, %21, %22 : vector<8x128xi32>
      %cst_14 = arith.constant -1.000000e+30 : f32
      %24 = vector.broadcast %cst_14 : f32 to vector<8x128xf32>
      %25 = arith.select %23, %7, %24 : vector<8x128xi1>, vector<8x128xf32>
      %cst_15 = arith.constant dense<0xFF800000> : vector<8xf32>
      %26 = vector.multi_reduction <maximumf>, %25, %cst_15 [1] : vector<8x128xf32> to vector<8xf32>
      %27 = vector.shape_cast %26 : vector<8xf32> to vector<8x1xf32>
      %c0_16 = arith.constant 0 : index
      %c0_17 = arith.constant 0 : index
      %28 = vector.load %arg9[%c0_16, %c0_17] : memref<8x1xf32, #tpu.memory_space<vmem>>, vector<8x1xf32>
      %29 = arith.maximumf %28, %27 : vector<8x1xf32>
      %c0_18 = arith.constant 0 : index
      %c0_19 = arith.constant 0 : index
      %30 = vector.load %arg9[%c0_18, %c0_19] : memref<8x1xf32, #tpu.memory_space<vmem>>, vector<8x1xf32>
      %31 = arith.subf %30, %29 : vector<8x1xf32>
      %32 = math.exp %31 : vector<8x1xf32>
      %33 = vector.broadcast %29 : vector<8x1xf32> to vector<8x128xf32>
      %34 = arith.subf %25, %33 : vector<8x128xf32>
      %35 = math.exp %34 : vector<8x128xf32>
      %c0_20 = arith.constant 0 : index
      %c0_21 = arith.constant 0 : index
      %36 = vector.load %arg10[%c0_20, %c0_21] : memref<8x1xf32, #tpu.memory_space<vmem>>, vector<8x1xf32>
      %37 = arith.mulf %32, %36 : vector<8x1xf32>
      %cst_22 = arith.constant dense<0.000000e+00> : vector<8xf32>
      %38 = vector.multi_reduction <add>, %35, %cst_22 [1] : vector<8x128xf32> to vector<8xf32>
      %39 = vector.shape_cast %38 : vector<8xf32> to vector<8x1xf32>
      %40 = arith.addf %37, %39 : vector<8x1xf32>
      %c0_23 = arith.constant 0 : index
      %c0_24 = arith.constant 0 : index
      %41 = vector.load %arg10[%c0_23, %c0_24] : memref<8x1xf32, #tpu.memory_space<vmem>>, vector<8x1xf32>
      tpu.vector_store %arg10[%c0_23, %c0_24], %40 {strides = array<i32>} : memref<8x1xf32, #tpu.memory_space<vmem>>, vector<8x1xf32>,
      %c0_25 = arith.constant 0 : index
      %c0_26 = arith.constant 0 : index
      %42 = vector.load %arg9[%c0_25, %c0_26] : memref<8x1xf32, #tpu.memory_space<vmem>>, vector<8x1xf32>
      tpu.vector_store %arg9[%c0_25, %c0_26], %29 {strides = array<i32>} : memref<8x1xf32, #tpu.memory_space<vmem>>, vector<8x1xf32>,
      %c0_i32_27 = arith.constant 0 : i32
      %43 = arith.cmpi eq, %arg0, %c0_i32_27 : i32
      %44 = arith.extui %43 : i1 to i32
      %c0_i32_28 = arith.constant 0 : i32
      %45 = arith.cmpi ne, %44, %c0_i32_28 : i32
      scf.if %45 {
        %c0_30 = arith.constant 0 : index
        %c0_31 = arith.constant 0 : index
        %49 = vector.load %arg14[%c0_30, %c0_31] : memref<8x1xf32, #tpu.memory_space<vmem>>, vector<8x1xf32>
        %50 = vector.broadcast %49 : vector<8x1xf32> to vector<8x128xf32>
        %51 = arith.cmpf ogt, %25, %50 : vector<8x128xf32>
        %52 = arith.extui %51 : vector<8x128xi1> to vector<8x128xi32>
        %53 = arith.sitofp %52 : vector<8x128xi32> to vector<8x128xf32>
        %c0_32 = arith.constant 0 : index
        %c0_33 = arith.constant 0 : index
        %54 = vector.load %arg13[%c0_32, %c0_33] : memref<8x1xf32, #tpu.memory_space<vmem>>, vector<8x1xf32>
        %cst_34 = arith.constant dense<0.000000e+00> : vector<8xf32>
        %55 = vector.multi_reduction <add>, %53, %cst_34 [1] : vector<8x128xf32> to vector<8xf32>
        %56 = vector.shape_cast %55 : vector<8xf32> to vector<8x1xf32>
        %57 = arith.addf %54, %56 : vector<8x1xf32>
        %c0_35 = arith.constant 0 : index
        %c0_36 = arith.constant 0 : index
        %58 = vector.load %arg13[%c0_35, %c0_36] : memref<8x1xf32, #tpu.memory_space<vmem>>, vector<8x1xf32>
        tpu.vector_store %arg13[%c0_35, %c0_36], %57 {strides = array<i32>} : memref<8x1xf32, #tpu.memory_space<vmem>>, vector<8x1xf32>,
      } else {
      }
      %c1_i32 = arith.constant 1 : i32
      %46 = arith.cmpi eq, %arg0, %c1_i32 : i32
      %47 = arith.extui %46 : i1 to i32
      %c0_i32_29 = arith.constant 0 : i32
      %48 = arith.cmpi ne, %47, %c0_i32_29 : i32
      scf.if %48 {
        %c0_30 = arith.constant 0 : index
        %c0_31 = arith.constant 0 : index
        %49 = vector.load %arg5[%c0_30, %c0_31] : memref<8x8xf32, #tpu.memory_space<vmem>>, vector<8x8xf32>
        %c0_32 = arith.constant 0 : index
        %c0_33 = arith.constant 0 : index
        %50 = vector.load %arg6[%c0_32, %c0_33] : memref<8x128xf32, #tpu.memory_space<vmem>>, vector<8x128xf32>
        %cst_34 = arith.constant 0.000000e+00 : f32
        %51 = vector.broadcast %cst_34 : f32 to vector<8x128xf32>
        %52 = vector.extract_strided_slice %49 {offsets = [0, 0], sizes = [8, 1], strides = [1, 1]} : vector<8x8xf32> to vector<8x1xf32>
        %53 = vector.extract_strided_slice %50 {offsets = [0, 0], sizes = [1, 128], strides = [1, 1]} : vector<8x128xf32> to vector<1x128xf32>
        %54 = vector.broadcast %52 : vector<8x1xf32> to vector<8x128xf32>
        %55 = vector.broadcast %53 : vector<1x128xf32> to vector<8x128xf32>
        %56 = arith.subf %54, %55 : vector<8x128xf32>
        %57 = math.absf %56 : vector<8x128xf32>
        %58 = arith.addf %51, %57 : vector<8x128xf32>
        %59 = vector.extract_strided_slice %49 {offsets = [0, 1], sizes = [8, 1], strides = [1, 1]} : vector<8x8xf32> to vector<8x1xf32>
        %60 = vector.extract_strided_slice %50 {offsets = [1, 0], sizes = [1, 128], strides = [1, 1]} : vector<8x128xf32> to vector<1x128xf32>
        %61 = vector.broadcast %59 : vector<8x1xf32> to vector<8x128xf32>
        %62 = vector.broadcast %60 : vector<1x128xf32> to vector<8x128xf32>
        %63 = arith.subf %61, %62 : vector<8x128xf32>
        %64 = math.absf %63 : vector<8x128xf32>
        %65 = arith.addf %58, %64 : vector<8x128xf32>
        %66 = vector.extract_strided_slice %49 {offsets = [0, 2], sizes = [8, 1], strides = [1, 1]} : vector<8x8xf32> to vector<8x1xf32>
        %67 = vector.extract_strided_slice %50 {offsets = [2, 0], sizes = [1, 128], strides = [1, 1]} : vector<8x128xf32> to vector<1x128xf32>
        %68 = vector.broadcast %66 : vector<8x1xf32> to vector<8x128xf32>
        %69 = vector.broadcast %67 : vector<1x128xf32> to vector<8x128xf32>
        %70 = arith.subf %68, %69 : vector<8x128xf32>
        %71 = math.absf %70 : vector<8x128xf32>
        %72 = arith.addf %65, %71 : vector<8x128xf32>
        %73 = vector.extract_strided_slice %49 {offsets = [0, 3], sizes = [8, 1], strides = [1, 1]} : vector<8x8xf32> to vector<8x1xf32>
        %74 = vector.extract_strided_slice %50 {offsets = [3, 0], sizes = [1, 128], strides = [1, 1]} : vector<8x128xf32> to vector<1x128xf32>
        %75 = vector.broadcast %73 : vector<8x1xf32> to vector<8x128xf32>
        %76 = vector.broadcast %74 : vector<1x128xf32> to vector<8x128xf32>
        %77 = arith.subf %75, %76 : vector<8x128xf32>
        %78 = math.absf %77 : vector<8x128xf32>
        %79 = arith.addf %72, %78 : vector<8x128xf32>
        %80 = vector.extract_strided_slice %49 {offsets = [0, 4], sizes = [8, 1], strides = [1, 1]} : vector<8x8xf32> to vector<8x1xf32>
        %81 = vector.extract_strided_slice %50 {offsets = [4, 0], sizes = [1, 128], strides = [1, 1]} : vector<8x128xf32> to vector<1x128xf32>
        %82 = vector.broadcast %80 : vector<8x1xf32> to vector<8x128xf32>
        %83 = vector.broadcast %81 : vector<1x128xf32> to vector<8x128xf32>
        %84 = arith.subf %82, %83 : vector<8x128xf32>
        %85 = math.absf %84 : vector<8x128xf32>
        %86 = arith.addf %79, %85 : vector<8x128xf32>
        %87 = vector.extract_strided_slice %49 {offsets = [0, 5], sizes = [8, 1], strides = [1, 1]} : vector<8x8xf32> to vector<8x1xf32>
        %88 = vector.extract_strided_slice %50 {offsets = [5, 0], sizes = [1, 128], strides = [1, 1]} : vector<8x128xf32> to vector<1x128xf32>
        %89 = vector.broadcast %87 : vector<8x1xf32> to vector<8x128xf32>
        %90 = vector.broadcast %88 : vector<1x128xf32> to vector<8x128xf32>
        %91 = arith.subf %89, %90 : vector<8x128xf32>
        %92 = math.absf %91 : vector<8x128xf32>
        %93 = arith.addf %86, %92 : vector<8x128xf32>
        %94 = vector.extract_strided_slice %49 {offsets = [0, 6], sizes = [8, 1], strides = [1, 1]} : vector<8x8xf32> to vector<8x1xf32>
        %95 = vector.extract_strided_slice %50 {offsets = [6, 0], sizes = [1, 128], strides = [1, 1]} : vector<8x128xf32> to vector<1x128xf32>
        %96 = vector.broadcast %94 : vector<8x1xf32> to vector<8x128xf32>
        %97 = vector.broadcast %95 : vector<1x128xf32> to vector<8x128xf32>
        %98 = arith.subf %96, %97 : vector<8x128xf32>
        %99 = math.absf %98 : vector<8x128xf32>
        %100 = arith.addf %93, %99 : vector<8x128xf32>
        %101 = vector.extract_strided_slice %49 {offsets = [0, 7], sizes = [8, 1], strides = [1, 1]} : vector<8x8xf32> to vector<8x1xf32>
        %102 = vector.extract_strided_slice %50 {offsets = [7, 0], sizes = [1, 128], strides = [1, 1]} : vector<8x128xf32> to vector<1x128xf32>
        %103 = vector.broadcast %101 : vector<8x1xf32> to vector<8x128xf32>
        %104 = vector.broadcast %102 : vector<1x128xf32> to vector<8x128xf32>
        %105 = arith.subf %103, %104 : vector<8x128xf32>
        %106 = math.absf %105 : vector<8x128xf32>
        %107 = arith.addf %100, %106 : vector<8x128xf32>
        %cst_35 = arith.constant 9.000000e+00 : f32
        %108 = vector.broadcast %cst_35 : f32 to vector<8x128xf32>
        %109 = arith.cmpf olt, %107, %108 : vector<8x128xf32>
        %110 = arith.extui %109 : vector<8x128xi1> to vector<8x128xi32>
        %111 = arith.sitofp %110 : vector<8x128xi32> to vector<8x128xf32>
        %c0_36 = arith.constant 0 : index
        %c0_37 = arith.constant 0 : index
        %112 = vector.load %arg11[%c0_36, %c0_37] : memref<8x1xf32, #tpu.memory_space<vmem>>, vector<8x1xf32>
        %113 = arith.mulf %111, %7 : vector<8x128xf32>
        %cst_38 = arith.constant dense<0.000000e+00> : vector<8xf32>
        %114 = vector.multi_reduction <add>, %113, %cst_38 [1] : vector<8x128xf32> to vector<8xf32>
        %115 = vector.shape_cast %114 : vector<8xf32> to vector<8x1xf32>
        %116 = arith.addf %112, %115 : vector<8x1xf32>
        %c0_39 = arith.constant 0 : index
        %c0_40 = arith.constant 0 : index
        %117 = vector.load %arg11[%c0_39, %c0_40] : memref<8x1xf32, #tpu.memory_space<vmem>>, vector<8x1xf32>
        tpu.vector_store %arg11[%c0_39, %c0_40], %116 {strides = array<i32>} : memref<8x1xf32, #tpu.memory_space<vmem>>, vector<8x1xf32>,
        %c0_41 = arith.constant 0 : index
        %c0_42 = arith.constant 0 : index
        %118 = vector.load %arg12[%c0_41, %c0_42] : memref<8x1xf32, #tpu.memory_space<vmem>>, vector<8x1xf32>
        %cst_43 = arith.constant dense<0.000000e+00> : vector<8xf32>
        %119 = vector.multi_reduction <add>, %111, %cst_43 [1] : vector<8x128xf32> to vector<8xf32>
        %120 = vector.shape_cast %119 : vector<8xf32> to vector<8x1xf32>
        %121 = arith.addf %118, %120 : vector<8x1xf32>
        %c0_44 = arith.constant 0 : index
        %c0_45 = arith.constant 0 : index
        %122 = vector.load %arg12[%c0_44, %c0_45] : memref<8x1xf32, #tpu.memory_space<vmem>>, vector<8x1xf32>
        tpu.vector_store %arg12[%c0_44, %c0_45], %121 {strides = array<i32>} : memref<8x1xf32, #tpu.memory_space<vmem>>, vector<8x1xf32>,
      } else {
      }
    } else {
    }
    %c0_i32_10 = arith.constant 0 : i32
    %15 = arith.cmpi slt, %arg1, %c0_i32_10 : i32
    %16 = arith.extui %15 : i1 to i32
    %c0_i32_11 = arith.constant 0 : i32
    %17 = arith.cmpi ne, %16, %c0_i32_11 : i32
    scf.if %17 {
      %cst_14 = arith.constant dense<0xFF800000> : vector<8xf32>
      %21 = vector.multi_reduction <maximumf>, %7, %cst_14 [1] : vector<8x128xf32> to vector<8xf32>
      %22 = vector.shape_cast %21 : vector<8xf32> to vector<8x1xf32>
      %c0_15 = arith.constant 0 : index
      %c0_16 = arith.constant 0 : index
      %23 = vector.load %arg9[%c0_15, %c0_16] : memref<8x1xf32, #tpu.memory_space<vmem>>, vector<8x1xf32>
      %24 = arith.maximumf %23, %22 : vector<8x1xf32>
      %c0_17 = arith.constant 0 : index
      %c0_18 = arith.constant 0 : index
      %25 = vector.load %arg9[%c0_17, %c0_18] : memref<8x1xf32, #tpu.memory_space<vmem>>, vector<8x1xf32>
      %26 = arith.subf %25, %24 : vector<8x1xf32>
      %27 = math.exp %26 : vector<8x1xf32>
      %28 = vector.broadcast %24 : vector<8x1xf32> to vector<8x128xf32>
      %29 = arith.subf %7, %28 : vector<8x128xf32>
      %30 = math.exp %29 : vector<8x128xf32>
      %c0_19 = arith.constant 0 : index
      %c0_20 = arith.constant 0 : index
      %31 = vector.load %arg10[%c0_19, %c0_20] : memref<8x1xf32, #tpu.memory_space<vmem>>, vector<8x1xf32>
      %32 = arith.mulf %27, %31 : vector<8x1xf32>
      %cst_21 = arith.constant dense<0.000000e+00> : vector<8xf32>
      %33 = vector.multi_reduction <add>, %30, %cst_21 [1] : vector<8x128xf32> to vector<8xf32>
      %34 = vector.shape_cast %33 : vector<8xf32> to vector<8x1xf32>
      %35 = arith.addf %32, %34 : vector<8x1xf32>
      %c0_22 = arith.constant 0 : index
      %c0_23 = arith.constant 0 : index
      %36 = vector.load %arg10[%c0_22, %c0_23] : memref<8x1xf32, #tpu.memory_space<vmem>>, vector<8x1xf32>
      tpu.vector_store %arg10[%c0_22, %c0_23], %35 {strides = array<i32>} : memref<8x1xf32, #tpu.memory_space<vmem>>, vector<8x1xf32>,
      %c0_24 = arith.constant 0 : index
      %c0_25 = arith.constant 0 : index
      %37 = vector.load %arg9[%c0_24, %c0_25] : memref<8x1xf32, #tpu.memory_space<vmem>>, vector<8x1xf32>
      tpu.vector_store %arg9[%c0_24, %c0_25], %24 {strides = array<i32>} : memref<8x1xf32, #tpu.memory_space<vmem>>, vector<8x1xf32>,
      %c0_i32_26 = arith.constant 0 : i32
      %38 = arith.cmpi eq, %arg0, %c0_i32_26 : i32
      %39 = arith.extui %38 : i1 to i32
      %c0_i32_27 = arith.constant 0 : i32
      %40 = arith.cmpi ne, %39, %c0_i32_27 : i32
      scf.if %40 {
        %c0_29 = arith.constant 0 : index
        %c0_30 = arith.constant 0 : index
        %44 = vector.load %arg14[%c0_29, %c0_30] : memref<8x1xf32, #tpu.memory_space<vmem>>, vector<8x1xf32>
        %45 = vector.broadcast %44 : vector<8x1xf32> to vector<8x128xf32>
        %46 = arith.cmpf ogt, %7, %45 : vector<8x128xf32>
        %47 = arith.extui %46 : vector<8x128xi1> to vector<8x128xi32>
        %48 = arith.sitofp %47 : vector<8x128xi32> to vector<8x128xf32>
        %c0_31 = arith.constant 0 : index
        %c0_32 = arith.constant 0 : index
        %49 = vector.load %arg13[%c0_31, %c0_32] : memref<8x1xf32, #tpu.memory_space<vmem>>, vector<8x1xf32>
        %cst_33 = arith.constant dense<0.000000e+00> : vector<8xf32>
        %50 = vector.multi_reduction <add>, %48, %cst_33 [1] : vector<8x128xf32> to vector<8xf32>
        %51 = vector.shape_cast %50 : vector<8xf32> to vector<8x1xf32>
        %52 = arith.addf %49, %51 : vector<8x1xf32>
        %c0_34 = arith.constant 0 : index
        %c0_35 = arith.constant 0 : index
        %53 = vector.load %arg13[%c0_34, %c0_35] : memref<8x1xf32, #tpu.memory_space<vmem>>, vector<8x1xf32>
        tpu.vector_store %arg13[%c0_34, %c0_35], %52 {strides = array<i32>} : memref<8x1xf32, #tpu.memory_space<vmem>>, vector<8x1xf32>,
      } else {
      }
      %c1_i32 = arith.constant 1 : i32
      %41 = arith.cmpi eq, %arg0, %c1_i32 : i32
      %42 = arith.extui %41 : i1 to i32
      %c0_i32_28 = arith.constant 0 : i32
      %43 = arith.cmpi ne, %42, %c0_i32_28 : i32
      scf.if %43 {
        %c0_29 = arith.constant 0 : index
        %c0_30 = arith.constant 0 : index
        %44 = vector.load %arg5[%c0_29, %c0_30] : memref<8x8xf32, #tpu.memory_space<vmem>>, vector<8x8xf32>
        %c0_31 = arith.constant 0 : index
        %c0_32 = arith.constant 0 : index
        %45 = vector.load %arg6[%c0_31, %c0_32] : memref<8x128xf32, #tpu.memory_space<vmem>>, vector<8x128xf32>
        %cst_33 = arith.constant 0.000000e+00 : f32
        %46 = vector.broadcast %cst_33 : f32 to vector<8x128xf32>
        %47 = vector.extract_strided_slice %44 {offsets = [0, 0], sizes = [8, 1], strides = [1, 1]} : vector<8x8xf32> to vector<8x1xf32>
        %48 = vector.extract_strided_slice %45 {offsets = [0, 0], sizes = [1, 128], strides = [1, 1]} : vector<8x128xf32> to vector<1x128xf32>
        %49 = vector.broadcast %47 : vector<8x1xf32> to vector<8x128xf32>
        %50 = vector.broadcast %48 : vector<1x128xf32> to vector<8x128xf32>
        %51 = arith.subf %49, %50 : vector<8x128xf32>
        %52 = math.absf %51 : vector<8x128xf32>
        %53 = arith.addf %46, %52 : vector<8x128xf32>
        %54 = vector.extract_strided_slice %44 {offsets = [0, 1], sizes = [8, 1], strides = [1, 1]} : vector<8x8xf32> to vector<8x1xf32>
        %55 = vector.extract_strided_slice %45 {offsets = [1, 0], sizes = [1, 128], strides = [1, 1]} : vector<8x128xf32> to vector<1x128xf32>
        %56 = vector.broadcast %54 : vector<8x1xf32> to vector<8x128xf32>
        %57 = vector.broadcast %55 : vector<1x128xf32> to vector<8x128xf32>
        %58 = arith.subf %56, %57 : vector<8x128xf32>
        %59 = math.absf %58 : vector<8x128xf32>
        %60 = arith.addf %53, %59 : vector<8x128xf32>
        %61 = vector.extract_strided_slice %44 {offsets = [0, 2], sizes = [8, 1], strides = [1, 1]} : vector<8x8xf32> to vector<8x1xf32>
        %62 = vector.extract_strided_slice %45 {offsets = [2, 0], sizes = [1, 128], strides = [1, 1]} : vector<8x128xf32> to vector<1x128xf32>
        %63 = vector.broadcast %61 : vector<8x1xf32> to vector<8x128xf32>
        %64 = vector.broadcast %62 : vector<1x128xf32> to vector<8x128xf32>
        %65 = arith.subf %63, %64 : vector<8x128xf32>
        %66 = math.absf %65 : vector<8x128xf32>
        %67 = arith.addf %60, %66 : vector<8x128xf32>
        %68 = vector.extract_strided_slice %44 {offsets = [0, 3], sizes = [8, 1], strides = [1, 1]} : vector<8x8xf32> to vector<8x1xf32>
        %69 = vector.extract_strided_slice %45 {offsets = [3, 0], sizes = [1, 128], strides = [1, 1]} : vector<8x128xf32> to vector<1x128xf32>
        %70 = vector.broadcast %68 : vector<8x1xf32> to vector<8x128xf32>
        %71 = vector.broadcast %69 : vector<1x128xf32> to vector<8x128xf32>
        %72 = arith.subf %70, %71 : vector<8x128xf32>
        %73 = math.absf %72 : vector<8x128xf32>
        %74 = arith.addf %67, %73 : vector<8x128xf32>
        %75 = vector.extract_strided_slice %44 {offsets = [0, 4], sizes = [8, 1], strides = [1, 1]} : vector<8x8xf32> to vector<8x1xf32>
        %76 = vector.extract_strided_slice %45 {offsets = [4, 0], sizes = [1, 128], strides = [1, 1]} : vector<8x128xf32> to vector<1x128xf32>
        %77 = vector.broadcast %75 : vector<8x1xf32> to vector<8x128xf32>
        %78 = vector.broadcast %76 : vector<1x128xf32> to vector<8x128xf32>
        %79 = arith.subf %77, %78 : vector<8x128xf32>
        %80 = math.absf %79 : vector<8x128xf32>
        %81 = arith.addf %74, %80 : vector<8x128xf32>
        %82 = vector.extract_strided_slice %44 {offsets = [0, 5], sizes = [8, 1], strides = [1, 1]} : vector<8x8xf32> to vector<8x1xf32>
        %83 = vector.extract_strided_slice %45 {offsets = [5, 0], sizes = [1, 128], strides = [1, 1]} : vector<8x128xf32> to vector<1x128xf32>
        %84 = vector.broadcast %82 : vector<8x1xf32> to vector<8x128xf32>
        %85 = vector.broadcast %83 : vector<1x128xf32> to vector<8x128xf32>
        %86 = arith.subf %84, %85 : vector<8x128xf32>
        %87 = math.absf %86 : vector<8x128xf32>
        %88 = arith.addf %81, %87 : vector<8x128xf32>
        %89 = vector.extract_strided_slice %44 {offsets = [0, 6], sizes = [8, 1], strides = [1, 1]} : vector<8x8xf32> to vector<8x1xf32>
        %90 = vector.extract_strided_slice %45 {offsets = [6, 0], sizes = [1, 128], strides = [1, 1]} : vector<8x128xf32> to vector<1x128xf32>
        %91 = vector.broadcast %89 : vector<8x1xf32> to vector<8x128xf32>
        %92 = vector.broadcast %90 : vector<1x128xf32> to vector<8x128xf32>
        %93 = arith.subf %91, %92 : vector<8x128xf32>
        %94 = math.absf %93 : vector<8x128xf32>
        %95 = arith.addf %88, %94 : vector<8x128xf32>
        %96 = vector.extract_strided_slice %44 {offsets = [0, 7], sizes = [8, 1], strides = [1, 1]} : vector<8x8xf32> to vector<8x1xf32>
        %97 = vector.extract_strided_slice %45 {offsets = [7, 0], sizes = [1, 128], strides = [1, 1]} : vector<8x128xf32> to vector<1x128xf32>
        %98 = vector.broadcast %96 : vector<8x1xf32> to vector<8x128xf32>
        %99 = vector.broadcast %97 : vector<1x128xf32> to vector<8x128xf32>
        %100 = arith.subf %98, %99 : vector<8x128xf32>
        %101 = math.absf %100 : vector<8x128xf32>
        %102 = arith.addf %95, %101 : vector<8x128xf32>
        %cst_34 = arith.constant 9.000000e+00 : f32
        %103 = vector.broadcast %cst_34 : f32 to vector<8x128xf32>
        %104 = arith.cmpf olt, %102, %103 : vector<8x128xf32>
        %105 = arith.extui %104 : vector<8x128xi1> to vector<8x128xi32>
        %106 = arith.sitofp %105 : vector<8x128xi32> to vector<8x128xf32>
        %c0_35 = arith.constant 0 : index
        %c0_36 = arith.constant 0 : index
        %107 = vector.load %arg11[%c0_35, %c0_36] : memref<8x1xf32, #tpu.memory_space<vmem>>, vector<8x1xf32>
        %108 = arith.mulf %106, %7 : vector<8x128xf32>
        %cst_37 = arith.constant dense<0.000000e+00> : vector<8xf32>
        %109 = vector.multi_reduction <add>, %108, %cst_37 [1] : vector<8x128xf32> to vector<8xf32>
        %110 = vector.shape_cast %109 : vector<8xf32> to vector<8x1xf32>
        %111 = arith.addf %107, %110 : vector<8x1xf32>
        %c0_38 = arith.constant 0 : index
        %c0_39 = arith.constant 0 : index
        %112 = vector.load %arg11[%c0_38, %c0_39] : memref<8x1xf32, #tpu.memory_space<vmem>>, vector<8x1xf32>
        tpu.vector_store %arg11[%c0_38, %c0_39], %111 {strides = array<i32>} : memref<8x1xf32, #tpu.memory_space<vmem>>, vector<8x1xf32>,
        %c0_40 = arith.constant 0 : index
        %c0_41 = arith.constant 0 : index
        %113 = vector.load %arg12[%c0_40, %c0_41] : memref<8x1xf32, #tpu.memory_space<vmem>>, vector<8x1xf32>
        %cst_42 = arith.constant dense<0.000000e+00> : vector<8xf32>
        %114 = vector.multi_reduction <add>, %106, %cst_42 [1] : vector<8x128xf32> to vector<8xf32>
        %115 = vector.shape_cast %114 : vector<8xf32> to vector<8x1xf32>
        %116 = arith.addf %113, %115 : vector<8x1xf32>
        %c0_43 = arith.constant 0 : index
        %c0_44 = arith.constant 0 : index
        %117 = vector.load %arg12[%c0_43, %c0_44] : memref<8x1xf32, #tpu.memory_space<vmem>>, vector<8x1xf32>
        tpu.vector_store %arg12[%c0_43, %c0_44], %116 {strides = array<i32>} : memref<8x1xf32, #tpu.memory_space<vmem>>, vector<8x1xf32>,
      } else {
      }
    } else {
    }
    %c0_i32_12 = arith.constant 0 : i32
    %18 = arith.cmpi eq, %arg1, %c0_i32_12 : i32
    %19 = arith.extui %18 : i1 to i32
    %c0_i32_13 = arith.constant 0 : i32
    %20 = arith.cmpi ne, %19, %c0_i32_13 : i32
    scf.if %20 {
      %c0_14 = arith.constant 0 : index
      %c0_15 = arith.constant 0 : index
      %21 = vector.load %arg9[%c0_14, %c0_15] : memref<8x1xf32, #tpu.memory_space<vmem>>, vector<8x1xf32>
      %c0_16 = arith.constant 0 : index
      %c0_17 = arith.constant 0 : index
      %22 = vector.load %arg10[%c0_16, %c0_17] : memref<8x1xf32, #tpu.memory_space<vmem>>, vector<8x1xf32>
      %23 = math.log %22 : vector<8x1xf32>
      %24 = arith.addf %21, %23 : vector<8x1xf32>
      %c0_18 = arith.constant 0 : index
      %c0_19 = arith.constant 0 : index
      %25 = vector.load %arg11[%c0_18, %c0_19] : memref<8x1xf32, #tpu.memory_space<vmem>>, vector<8x1xf32>
      %c0_20 = arith.constant 0 : index
      %c0_21 = arith.constant 0 : index
      %26 = vector.load %arg12[%c0_20, %c0_21] : memref<8x1xf32, #tpu.memory_space<vmem>>, vector<8x1xf32>
      %27 = arith.divf %25, %26 : vector<8x1xf32>
      %28 = arith.subf %24, %27 : vector<8x1xf32>
      %cst_22 = arith.constant dense<0.000000e+00> : vector<1xf32>
      %29 = vector.multi_reduction <add>, %28, %cst_22 [0] : vector<8x1xf32> to vector<1xf32>
      %30 = vector.shape_cast %29 : vector<1xf32> to vector<1x1xf32>
      %cst_23 = arith.constant 1.250000e-01 : f32
      %31 = vector.broadcast %cst_23 : f32 to vector<1x1xf32>
      %32 = arith.mulf %30, %31 : vector<1x1xf32>
      %c0_24 = arith.constant 0 : index
      %c0_25 = arith.constant 0 : index
      %33 = vector.load %arg13[%c0_24, %c0_25] : memref<8x1xf32, #tpu.memory_space<vmem>>, vector<8x1xf32>
      %cst_26 = arith.constant 1.000000e+00 : f32
      %34 = vector.broadcast %cst_26 : f32 to vector<8x1xf32>
      %35 = arith.cmpf olt, %33, %34 : vector<8x1xf32>
      %36 = arith.extui %35 : vector<8x1xi1> to vector<8x1xi32>
      %37 = arith.sitofp %36 : vector<8x1xi32> to vector<8x1xf32>
      %cst_27 = arith.constant dense<0.000000e+00> : vector<1xf32>
      %38 = vector.multi_reduction <add>, %37, %cst_27 [0] : vector<8x1xf32> to vector<1xf32>
      %39 = vector.shape_cast %38 : vector<1xf32> to vector<1x1xf32>
      %cst_28 = arith.constant 1.250000e-01 : f32
      %40 = vector.broadcast %cst_28 : f32 to vector<1x1xf32>
      %41 = arith.mulf %39, %40 : vector<1x1xf32>
      %c0_29 = arith.constant 0 : index
      %c0_30 = arith.constant 0 : index
      %42 = vector.load %arg13[%c0_29, %c0_30] : memref<8x1xf32, #tpu.memory_space<vmem>>, vector<8x1xf32>
      %cst_31 = arith.constant 5.000000e+00 : f32
      %43 = vector.broadcast %cst_31 : f32 to vector<8x1xf32>
      %44 = arith.cmpf olt, %42, %43 : vector<8x1xf32>
      %45 = arith.extui %44 : vector<8x1xi1> to vector<8x1xi32>
      %46 = arith.sitofp %45 : vector<8x1xi32> to vector<8x1xf32>
      %cst_32 = arith.constant dense<0.000000e+00> : vector<1xf32>
      %47 = vector.multi_reduction <add>, %46, %cst_32 [0] : vector<8x1xf32> to vector<1xf32>
      %48 = vector.shape_cast %47 : vector<1xf32> to vector<1x1xf32>
      %cst_33 = arith.constant 1.250000e-01 : f32
      %49 = vector.broadcast %cst_33 : f32 to vector<1x1xf32>
      %50 = arith.mulf %48, %49 : vector<1x1xf32>
      %51 = tpu.iota {dimensions = array<i32: 1>} : vector<8x128xi32>
      %52 = tpu.iota {dimensions = array<i32: 0>} : vector<8x128xi32>
      %c0_i32_34 = arith.constant 0 : i32
      %53 = vector.broadcast %c0_i32_34 : i32 to vector<8x128xi32>
      %54 = arith.cmpi eq, %52, %53 : vector<8x128xi32>
      %c0_i32_35 = arith.constant 0 : i32
      %55 = vector.broadcast %c0_i32_35 : i32 to vector<8x128xi32>
      %56 = arith.cmpi eq, %51, %55 : vector<8x128xi32>
      %57 = arith.andi %54, %56 : vector<8x128xi1>
      %cst_36 = arith.constant 0.000000e+00 : f32
      %58 = vector.shape_cast %32 : vector<1x1xf32> to vector<1x1xf32>
      %59 = vector.broadcast %58 : vector<1x1xf32> to vector<8x128xf32>
      %60 = vector.broadcast %cst_36 : f32 to vector<8x128xf32>
      %61 = arith.select %57, %59, %60 : vector<8x128xi1>, vector<8x128xf32>
      %c1_i32 = arith.constant 1 : i32
      %62 = vector.broadcast %c1_i32 : i32 to vector<8x128xi32>
      %63 = arith.cmpi eq, %51, %62 : vector<8x128xi32>
      %64 = arith.andi %54, %63 : vector<8x128xi1>
      %cst_37 = arith.constant 0.000000e+00 : f32
      %65 = vector.shape_cast %41 : vector<1x1xf32> to vector<1x1xf32>
      %66 = vector.broadcast %65 : vector<1x1xf32> to vector<8x128xf32>
      %67 = vector.broadcast %cst_37 : f32 to vector<8x128xf32>
      %68 = arith.select %64, %66, %67 : vector<8x128xi1>, vector<8x128xf32>
      %69 = arith.addf %61, %68 : vector<8x128xf32>
      %c2_i32 = arith.constant 2 : i32
      %70 = vector.broadcast %c2_i32 : i32 to vector<8x128xi32>
      %71 = arith.cmpi eq, %51, %70 : vector<8x128xi32>
      %72 = arith.andi %54, %71 : vector<8x128xi1>
      %cst_38 = arith.constant 0.000000e+00 : f32
      %73 = vector.shape_cast %50 : vector<1x1xf32> to vector<1x1xf32>
      %74 = vector.broadcast %73 : vector<1x1xf32> to vector<8x128xf32>
      %75 = vector.broadcast %cst_38 : f32 to vector<8x128xf32>
      %76 = arith.select %72, %74, %75 : vector<8x128xi1>, vector<8x128xf32>
      %77 = arith.addf %69, %76 : vector<8x128xf32>
      %c0_39 = arith.constant 0 : index
      %c0_40 = arith.constant 0 : index
      %78 = vector.load %arg7[%c0_39, %c0_40] : memref<8x128xf32, #tpu.memory_space<vmem>>, vector<8x128xf32>
      tpu.vector_store %arg7[%c0_39, %c0_40], %77 {strides = array<i32>} : memref<8x128xf32, #tpu.memory_space<vmem>>, vector<8x128xf32>,
    } else {
    }
    return
  }
  func.func @transform_0(%arg0: i32, %arg1: i32) -> (i32, i32) {
    %c0_i32 = arith.constant 0 : i32
    %c0_i32_0 = arith.constant 0 : i32
    return %c0_i32, %arg0 : i32, i32
  }
  func.func @transform_1(%arg0: i32, %arg1: i32) -> (i32, i32) {
    %c0_i32 = arith.constant 0 : i32
    %c0_i32_0 = arith.constant 0 : i32
    return %c0_i32, %arg0 : i32, i32
  }
  func.func @transform_2(%arg0: i32, %arg1: i32) -> (i32, i32) {
    %c0_i32 = arith.constant 0 : i32
    return %arg0, %arg1 : i32, i32
  }
  func.func @transform_3(%arg0: i32, %arg1: i32) -> (i32, i32) {
    %c0_i32 = arith.constant 0 : i32
    %c0_i32_0 = arith.constant 0 : i32
    %c0_i32_1 = arith.constant 0 : i32
    return %c0_i32, %c0_i32_0 : i32, i32
  }
  func.func @transform_4(%arg0: i32, %arg1: i32) -> (i32, i32) {
    %c0_i32 = arith.constant 0 : i32
    %c0_i32_0 = arith.constant 0 : i32
    return %c0_i32, %arg1 : i32, i32
  }
  func.func @transform_5(%arg0: i32, %arg1: i32) -> (i32, i32) {
    %c0_i32 = arith.constant 0 : i32
    %c0_i32_0 = arith.constant 0 : i32
    return %arg0, %c0_i32 : i32, i32
  }
  func.func @transform_6(%arg0: i32, %arg1: i32) -> (i32, i32, i32) {
    %c0_i32 = arith.constant 0 : i32
    %c0_i32_0 = arith.constant 0 : i32
    return %arg0, %c0_i32, %arg1 : i32, i32, i32
  }
}

</mosaic_0001>

<bundles_post_ra>
// kernel: tpu_custom_call.1
= control target key start
LH: loop header
LB: loop body
LE: loop exit
PB: predicated region body
PF: predicated region fallthrough
CT: control target
= control target key end

     0   :  { %s1976_s0 = inlined_call_operand.hbm [shape: bf16[8,256], index: 0, kind: input, shape index: {}]   ;;  %s1977_s1 = inlined_call_operand.hbm [shape: bf16[8,256], index: 1, kind: input, shape index: {}]   ;;  %s1978_s2 = inlined_call_operand.hbm [shape: bf16[256,128], index: 2, kind: input, shape index: {}]   ;;  %s1979_s3 = inlined_call_operand.hbm [shape: f32[8,8], index: 3, kind: input, shape index: {}]   ;;  %s1980_s4 = inlined_call_operand.hbm [shape: f32[8,128], index: 4, kind: input, shape index: {}]   ;;  %s1981_s5 = inlined_call_operand.hbm [shape: f32[16,128], index: 5, kind: output, shape index: {0}]   ;;  %s1982_s6 = inlined_call_operand.hbm [shape: bf16[2,8,128], index: 6, kind: output, shape index: {1}]  }
   0x1   :  { %1992 = sst [smem:[#allocation30_spill]] %s1977_s1 }
   0x2   :  { %1993 = sst [smem:[#allocation31_spill]] %s1979_s3 }
   0x3   :  { %12 = vsyncpa [#allocation9], 0 }
   0x4   :  { %14 = vsyncpa [#allocation9 + $0x1], 0 }
   0x5   :  { %15 = vsyncpa [#allocation12], 0 }
   0x6   :  { %17 = vsyncpa [#allocation12 + $0x1], 0 }
   0x7   :  { %18 = vsyncpa [#allocation15], 0 }
   0x8   :  { %19 = vsyncpa [#allocation10], 0 }
   0x9   :  { %21 = vsyncpa [#allocation10 + $0x1], 0 }
   0xa   :  { %22 = vsyncpa [#allocation19], 0 }
   0xb   :  { %24 = vsyncpa [#allocation19 + $0x1], 0  ;;  %s1663_s21 = smov 0   ;;  %s1665_s22 = smov 0  }
   0xc   :  { %s1667_s23 = smov 0   ;;  %s1669_s24 = smov 0  }
   0xd   :  { %s1671_s25 = smov 0   ;;  %s1673_s26 = smov 0  }
   0xe LB: > { %1994 = sst [smem:[#allocation25_spill]] %s1590_s23  ;;  %s1694_s27 = sadd.s32 4294967295, %s1602_s26   ;;  %s1602_s26 = sphi %s1673_s26, %s30_s26   ;;  %s1598_s25 = sphi %s1671_s25, %s2023_s25   ;;  %s1594_s24 = sphi %s1669_s24, %s2022_s24   ;;  %s1590_s23 = sphi %s1667_s23, %s2018_s23   ;;  %s1586_s22 = sphi %s1665_s22, %s2021_s22   ;;  %s1582_s21 = sphi %s1663_s21, %s2020_s21  }
   0xf   : > { %1995 = sst [smem:[#allocation26_spill]] %s1602_s26  ;;  %s1129_s28 = sadd.s32 4294967294, %s1602_s26  }
  0x10   : > { %p62_p0 = scmp.ne.s32.totalorder %s1586_s22, %s1582_s21  ;;  %p1987_p1 = scmp.eq.s32.totalorder %s1694_s27, 0 }
  0x11   : > { %p193_p3 = scmp.eq.s32.totalorder %s1129_s28, 1  ;;  %p1130_p5 = scmp.ge.s32.totalorder %s1602_s26, 1 }
  0x12   : > { %p1703_p4 = por %p1987_p1, %p62_p0  ;;  %p228_p7 = scmp.lt.s32.totalorder %s1602_s26, 3 }
  0x13   : > { %p1708_p6 = por %p193_p3, %p62_p0  ;;  %s1604_s8 = smov [#allocation14]  }
  0x14   : > { %p1713_p8 = pnand %p1130_p5, %p228_p7  ;;  %s241_s9 = sshll.u32 %s1604_s8, 4  ;;  %s242_s9 = int_to_ptr.vmem [resolvable:$true] %s241_s9 }
  0x15   : > { %s1997_s30 = scalar_select %p1708_p6, 1, 0 }
  0x16   : > { %p1221_p10 = pneg %p1713_p8  ;;  %s42_s11 = sadd.s32 1, %s1598_s25 }
  0x17   : > { %1998 = sst [smem:[#allocation27_spill]] %s1997_s30  ;;  %s49_s12 = sadd.s32 1, %s1590_s23 }
  0x18   : > { %p1722_p11 = pnand %p1221_p10, %p1987_p1  ;;  %p44_p12 = scmp.ge.s32.totalorder %s42_s11, 2 }
  0x19   : > { %s1359_s13 = scalar_lea.vmem %s242_s9, 128  ;;  %p1367_p7 = scmp.lt.s32.totalorder %s242_s9, %s242_s9 }
  0x1a   : > { %p1988_p13 = pneg %p1722_p11  ;;  %p1360_p0 = scmp.ne.s32.totalorder %s242_s9, %s1359_s13 }
  0x1b   : > { %p1368_p9 = scmp.lt.s32.totalorder %s1359_s13, %s1359_s13 }
  0x1c   : > { %p1362_p3 = pnand %p1360_p0, %p1988_p13 }
  0x1d   : > { %p1369_p2 = por %p1368_p9, %p1367_p7 }
  0x1e   : > { %p1363_p5 = pneg %p1362_p3 }
  0x20   : > { %p1370_p10 = pnand %p1369_p2, %p1363_p5 }
  0x22   : > { %1373 = shalt.err (!%p1370_p10)
}
  0x23   : > { %s2001_s3 = sld [smem:[#allocation31_spill]]  ;;  %s2025_s11 = smov (%p44_p12, %s42_s11), 0 }
  0x24   : > { %2002 = sst [smem:[#allocation28_spill]] %s2025_s11  ;;  %p56_p2 = scmp.ne.s32.totalorder %s1590_s23, %s1586_s22 }
  0x25   : > { %p57_p9 = scmp.eq.s32.totalorder %s1602_s26, 0  ;;  %s46_s16 = ssub.s32 %s1598_s25, %s2025_s11 }
  0x26   : > { %p1247_p0 = scmp.lt.s32.totalorder %s1602_s26, 2  ;;  %p47_p3 = scmp.eq.s32.totalorder %s46_s16, 0 }
  0x27   : > { %p58_p5 = por %p57_p9, %p56_p2  ;;  %p2003_p7 = scmp.eq.s32.totalorder %s1694_s27, 1 }
  0x28   : > { %s1753_s18 = sand.u32 1, %s1590_s23   ;;  %s1135_s28 = sshll.u32 %s1598_s25, 6 }
  0x29   : > { %1224 = dma.hbm_to_vmem [thread:$0]  (!%p1722_p11), %s2001_s3, 128, %s242_s9, [#allocation15]  }
  0x2a   : > { %p1748_p10 = por %p2003_p7, %p56_p2  ;;  %s1989_s20 = sshll.u32 %s1753_s18, 2 }
  0x2b   : > { %s1756_s19 = scalar_select %p47_p3, %s1590_s23, %s49_s12  }
  0x2c   : > { %p1760_p12 = pnand %p1247_p0, %p58_p5  ;;  %s283_s9 = sand.u32 1, %s1602_s26  }
  0x2d   : > { %2005 = sst [smem:[#allocation29_spill]] %s1756_s19  ;;  %s287_s16 = scalar_lea.vmem [#allocation11], %s1989_s20 }
  0x2e   : > { %s2007_s1 = sld [smem:[#allocation30_spill]]  ;;  %s294_s3 = sshll.u32 %s287_s16, 4  ;;  %s295_s3 = int_to_ptr.vmem [resolvable:$true] %s294_s3 }
  0x2f   : > { %s1138_s11 = sshll.u32 %s1753_s18, 6  ;;  %s1773_s12 = scalar_lea.sflag [#allocation12], %s283_s9 }
  0x30   : > { %p1990_p2 = pneg %p1760_p12  ;;  %s1387_s19 = scalar_lea.vmem %s295_s3, 64 }
  0x31   : > { %p1388_p9 = scmp.ne.s32.totalorder %s295_s3, %s1387_s19  ;;  %s1605_s23 = smov [#allocation11]  }
  0x32   : > { %s1392_s26 = sshll.u32 %s1605_s23, 4  ;;  %s1393_s26 = int_to_ptr.vmem [resolvable:$false] %s1392_s26 }
  0x33   : > { %p1390_p0 = pnand %p1388_p9, %p1990_p2  ;;  %s1394_s13 = scalar_lea.vmem %s1393_s26, 128 }
  0x34   : > { %s292_s15 = scalar_lea.hbm %s2007_s1, %s1135_s28  ;;  %p1395_p5 = scmp.lt.s32.totalorder %s295_s3, %s1393_s26 }
  0x35   : > { %p1391_p3 = pneg %p1390_p0  ;;  %p1396_p7 = scmp.lt.s32.totalorder %s1394_s13, %s1387_s19 }
  0x37   : > { %p1397_p1 = por %p1396_p7, %p1395_p5 }
  0x39   : > { %p1398_p13 = pnand %p1397_p1, %p1391_p3 }
  0x3b   : > { %1401 = shalt.err (!%p1398_p13)
}
  0x3c   : > { %1234 = dma.hbm_to_vmem [thread:$0]  (!%p1760_p12), %s292_s15, 64, %s295_s3, %s1773_s12  }
  0x3d   : > { %s305_s9 = scalar_lea.vmem [#allocation13], %s1138_s11  ;;  %s1606_s16 = smov [#allocation16]  }
  0x3e   : > { %s313_s14 = sshll.u32 %s305_s9, 4  ;;  %s254_s20 = sshll.u32 %s1606_s16, 4  ;;  %s1783_s14 = int_to_ptr.vmem [resolvable:$true] %s313_s14  ;;  %s255_s20 = int_to_ptr.vmem [resolvable:$true] %s254_s20 }
  0x3f   : > { %s1413_s23 = scalar_lea.vmem %s255_s20, 128  ;;  %p2008_p0 = pneg %p1722_p11 }
  0x40   : > { %p1414_p9 = scmp.ne.s32.totalorder %s255_s20, %s1413_s23  ;;  %p1421_p1 = scmp.lt.s32.totalorder %s255_s20, %s255_s20 }
  0x41   : > { %p1422_p13 = scmp.lt.s32.totalorder %s1413_s23, %s1413_s23 }
  0x42   : > { %p1416_p2 = pnand %p1414_p9, %p2008_p0 }
  0x43   : > { %p1423_p3 = por %p1422_p13, %p1421_p1 }
  0x44   : > { %p1417_p5 = pneg %p1416_p2 }
  0x46   : > { %p1424_p7 = pnand %p1423_p3, %p1417_p5 }
  0x48   : > { %1427 = shalt.err (!%p1424_p7)
}
  0x49   : > { %1227 = dma.hbm_to_vmem [thread:$0]  (!%p1722_p11), %s1980_s4, 128, %s255_s20, [#allocation15]  }
  0x4a   : > { %s274_s15 = scalar_lea.hbm %s1976_s0, %s1135_s28  ;;  %s2009_s13 = sshll.u32 %s1753_s18, 2 }
  0x4b   : > { %s269_s9 = scalar_lea.vmem [#allocation8], %s2009_s13  ;;  %s1173_s23 = sshll.u32 %s1598_s25, 10 }
  0x4c   : > { %s276_s16 = sshll.u32 %s269_s9, 4  ;;  %s1804_s3 = scalar_lea.hbm %s1978_s2, %s1173_s23  ;;  %s277_s16 = int_to_ptr.vmem [resolvable:$true] %s276_s16 }
  0x4d   : > { %s266_s26 = scalar_lea.sflag [#allocation9], %s1753_s18  ;;  %s1441_s30 = scalar_lea.vmem %s277_s16, 64 }
  0x4e   : > { %p1442_p2 = scmp.ne.s32.totalorder %s277_s16, %s1441_s30  ;;  %p2010_p11 = pneg %p1760_p12 }
  0x4f   : > { %s1607_s20 = smov [#allocation8]  }
  0x50   : > { %p1444_p9 = pnand %p1442_p2, %p2010_p11  ;;  %s1446_s11 = sshll.u32 %s1607_s20, 4  ;;  %s1447_s11 = int_to_ptr.vmem [resolvable:$false] %s1446_s11 }
  0x51   : > { %s1448_s28 = scalar_lea.vmem %s1447_s11, 128  ;;  %p1449_p5 = scmp.lt.s32.totalorder %s277_s16, %s1447_s11 }
  0x52   : > { %p1445_p0 = pneg %p1444_p9  ;;  %p1450_p1 = scmp.lt.s32.totalorder %s1448_s28, %s1441_s30 }
  0x54   : > { %p1451_p13 = por %p1450_p1, %p1449_p5 }
  0x56   : > { %p1452_p3 = pnand %p1451_p13, %p1445_p0 }
  0x58   : > { %1455 = shalt.err (!%p1452_p3)
}
  0x59   : > { %1231 = dma.hbm_to_vmem [thread:$0]  (!%p1760_p12), %s274_s15, 64, %s277_s16, %s266_s26  }
  0x5a   : > { %s1469_s1 = scalar_lea.vmem %s1783_s14, 1024  ;;  %p2011_p2 = pmov %p2010_p11 }
  0x5b   : > { %p1470_p7 = scmp.ne.s32.totalorder %s1783_s14, %s1469_s1  ;;  %s1608_s18 = smov [#allocation13]  }
  0x5c   : > { %s1474_s19 = sshll.u32 %s1608_s18, 4  ;;  %s1475_s19 = int_to_ptr.vmem [resolvable:$false] %s1474_s19 }
  0x5d   : > { %p1472_p11 = pnand %p1470_p7, %p2011_p2  ;;  %s1476_s30 = scalar_lea.vmem %s1475_s19, 2048 }
  0x5e   : > { %p1477_p5 = scmp.lt.s32.totalorder %s1783_s14, %s1475_s19  ;;  %p1478_p0 = scmp.lt.s32.totalorder %s1476_s30, %s1469_s1 }
  0x5f   : > { %p1473_p9 = pneg %p1472_p11 }
  0x60   : > { %p1479_p1 = por %p1478_p0, %p1477_p5 }
  0x62   : > { %p1480_p13 = pnand %p1479_p1, %p1473_p9 }
  0x64   : > { %1483 = shalt.err (!%p1480_p13)
}
  0x65   : > { %s1609_s13 = smov 64   ;;  %s1610_s15 = smov 4  }
  0x66   : > { %1237 = dma.hbm_to_vmem [thread:$0]  (!%p1760_p12), %s1804_s3, 1024, %s1783_s14, %s1773_s12, %s1609_s13, %s1609_s13, %s1610_s15  }
  0x67   : > { %325 = sbr.rel (%p1713_p8) target bundleno = 1524 (0x5f4), region = 40  ;;  %s1826_s9 = sand.u32 (!%p1713_p8), 1, %s1586_s22  }
  0x68   : > { %s1829_s16 = sshll.u32 (!%p1713_p8), %s1826_s9, 2  ;;  %s328_s23 = scalar_lea.sflag (!%p1713_p8), [#allocation9], %s1826_s9 }
  0x69   : > { %s331_s10 = scalar_lea.vmem (!%p1713_p8), [#allocation8], %s1829_s16 }
  0x6c   : > { %1561 = dma.done.wait (%p1703_p4), %s328_s23, 64  }
  0x6d   : > { %1563 = vsyncadd (%p1703_p4), %s328_s23, 4294967232  ;;  %s336_s7 = sand.u32 1, %s1694_s27   ;;  %s340_s12 = scalar_lea.vmem [#allocation11], %s1829_s16 }
  0x6e   : > { %s337_s8 = scalar_lea.sflag [#allocation12], %s336_s7 }
  0x6f   : > { %1565 = dma.done.wait (%p1703_p4), %s337_s8, 1088  }
  0x70   : > { %1567 = vsyncadd (%p1703_p4), %s337_s8, 4294966208  ;;  %s1144_s14 = sshll.u32 %s1826_s9, 6  ;;  %p2012_p8 = scmp.eq.s32.totalorder %s1694_s27, 0 }
  0x71   : > { %s1844_s3 = scalar_lea.vmem [#allocation13], %s1144_s14 }
  0x72   : > { %1569 = dma.done.wait (%p2012_p8), [#allocation15], 256   ;;  %p2013_p12 = pmov %p2012_p8 }
  0x73   : > { %s1147_s26 = sshll.u32 %s1826_s9, 3  ;;  %v1611_v0 = vmov 0.0   ;;  %vm1612_vm0 = vmmov 0   ;;  %v1320_v1 = vld [vmem:[%s1844_s3 + $0x38] sm:$0xff]   ;;  %v1321_v2 = vld [vmem:[%s1844_s3 + $0x30] sm:$0xff]   ;;  %v1322_v3 = vld [vmem:[%s1844_s3 + $0x28] sm:$0xff]   ;;  %v533_v17 = vlaneseq }
  0x74   : > { %1571 = vsyncadd (%p2013_p12), [#allocation15], 4294967040  ;;  %1183 = vmatprep.subr.bf16.mxu0 %v1611_v0  ;;  %1199 = vmatprep.mubr.msk.bf16.mxu0 %vm1612_vm0, %v1611_v0  ;;  %v407_v4 = vld [vmem:[%s331_s10] sm:$0xf]  ;;  %v409_v5 = vld [vmem:[%s340_s12] sm:$0xf] }
  0x75   : > { %1184 = vmatpush3.bf16.msra.mxu0 %v1320_v1  ;;  %v408_v6 = vunpack.c.l.bf16 %v407_v4  ;;  %v410_v7 = vunpack.c.l.bf16 %v409_v5  ;;  %v1323_v8 = vld [vmem:[%s1844_s3 + $0x20] sm:$0xff]   ;;  %v1324_v10 = vld [vmem:[%s1844_s3 + $0x18] sm:$0xff]   ;;  %v1325_v11 = vld [vmem:[%s1844_s3 + $0x10] sm:$0xff]   ;;  %vm415_vm1 = vcmask 7168   ;;  %v1878_v18 = vand.u32 127, %v533_v17  ;;  %s400_s27 = scalar_lea.vmem [#allocation18], %s1829_s16 }
  0x76   : > { %1185 = vmatprep.subr.bf16.mxu0 %v1611_v0  ;;  %v1326_v12 = vld [vmem:[%s1844_s3 + $0x8] sm:$0xff]   ;;  %v1327_v13 = vld [vmem:[%s1844_s3] sm:$0xff]   ;;  %v422_v14 = vld [vmem:[%s331_s10] sm:$0xf]  ;;  %421 = vst.msk [vmem:[#allocation6] sm:$0xff] %vm415_vm1, %v1611_v0  ;;  %v1613_v26 = vmov 0  }
  0x77   : > { %v411_v9 = vmul.f32 %v410_v7, %v408_v6  ;;  %vm535_vm2 = vcmp.lt.s32.totalorder %v1878_v18, 32  ;;  %1318 = vset.pattern.permute.xlu1 %v1613_v26  ;;  %1319 = vset.pattern.permute.xlu0 %v1613_v26  ;;  %v1614_v27 = vmov 1.0   ;;  %s1895_s29 = scalar_lea.vmem [#allocation17], %s1147_s26  ;;  %p1157_p4 = scmp.ne.s32.totalorder %s1594_s24, 0 }
  0x78   : > { %418 = vst.msk [vmem:[#allocation3] sm:$0xff] %vm415_vm1, %v1614_v27  ;;  %420 = vst.msk [vmem:[#allocation5] sm:$0xff] %vm415_vm1, %v1614_v27 }
  0x79   : > { %1186 = vmatpush3.bf16.msra.mxu0 %v1321_v2  ;;  %412 = vadd.xlane.f32.xlu0 %v411_v9 }
  0x7a   : > { %1187 = vmatprep.subr.bf16.mxu0 %v1611_v0 }
  0x7d   : > { %1188 = vmatpush3.bf16.msra.mxu0 %v1322_v3 }
  0x7e   : > { %1189 = vmatprep.subr.bf16.mxu0 %v1611_v0 }
  0x7f   : > { %v552_v38 = vld [vmem:[#allocation3] sm:$0xff] }
  0x81   : > { %1190 = vmatpush3.bf16.msra.mxu0 %v1323_v8 }
  0x82   : > { %1191 = vmatprep.subr.bf16.mxu0 %v1611_v0 }
  0x85   : > { %1192 = vmatpush3.bf16.msra.mxu0 %v1324_v10 }
  0x86   : > { %1193 = vmatprep.subr.bf16.mxu0 %v1611_v0 }
  0x89   : > { %1194 = vmatpush3.bf16.msra.mxu0 %v1325_v11 }
  0x8a   : > { %1195 = vmatprep.subr.bf16.mxu0 %v1611_v0 }
  0x8d   : > { %1196 = vmatpush3.bf16.msra.mxu0 %v1326_v12 }
  0x8e   : > { %1197 = vmatprep.subr.bf16.mxu0 %v1611_v0 }
  0x91   : > { %1198 = vmatpush3.bf16.msra.mxu0 %v1327_v13 }
  0x94   : > { %1200 = vmatmul.mubr.bf16.vlgmr.msra.gmra.mxu0 %v422_v14 }
 0x102   : > { %v413_v15 = vpop.xlane.xlu0 %412 }
 0x103   : > { %v414_v16 = vmul.f32 14.285714, %v413_v15 }
 0x105   : > { %416 = vst.msk [vmem:[#allocation7] sm:$0xff] %vm415_vm1, %v414_v16  ;;  %417 = vst.msk [vmem:[#allocation2] sm:$0xff] %vm415_vm1, %v414_v16 }
 0x106   : > { %419 = vst.msk [vmem:[#allocation4] sm:$0xff] %vm415_vm1, %v414_v16 }
 0x10c   : > { %v539_v28 = vld [vmem:[#allocation2] sm:$0xff] }
 0x154   : > { %v521_v19 = vpop.f32.mrf.mxu0 }
 0x155   : > { %v1881_v20 = vmul.f32 14.285714, %v521_v19  ;;  %v528_v21 = vpack.c.bf16 %v521_v19, %v521_v19 }
 0x156   : > { %v1201_v22 = vpop.f32.mrf.mxu0 }
 0x157   : > { %529 = vst [vmem:[%s400_s27] sm:$0xf] %v528_v21  ;;  %v536_v23 = vsel %vm535_vm2, %v1881_v20, -1e+30 }
 0x158   : > { %v524_v24 = vpop.f32.mrf.mxu0  ;;  %537 = vmax.xlane.f32.xlu0 %v536_v23 }
 0x15a   : > { %v1202_v25 = vpop.f32.mrf.mxu0 }
 0x1e1   : > { %v538_v29 = vpop.xlane.xlu0 %537 }
 0x1e2   : > { %v540_v30 = vmax.f32 %v539_v28, %v538_v29 }
 0x1e4   : > { %v541_v31 = vsub.f32 %v539_v28, %v540_v30  ;;  %559 = vst.msk [vmem:[#allocation2] sm:$0xff] %vm415_vm1, %v540_v30  ;;  %546 = vperm.xlu1 %1318, %v540_v30  }
 0x1e6   : > { %v542_v36 = vmul.f32 1.442695, %v541_v31 }
 0x25f   : > { %v547_v32 = vpop.permute.xlu1 %546 }
 0x260   : > { %v549_v33 = vsub.f32 %v536_v23, %v547_v32 }
 0x262   : > { %v550_v34 = vmul.f32 1.442695, %v549_v33 }
 0x264   : > { %1328 = vpow2.f32 %v550_v34 }
 0x265   : > { %1330 = vpow2.f32 %v542_v36 }
 0x271   : > { %v1329_v35 = vpop.eup %1328 }
 0x272   : > { %554 = vadd.xlane.f32.xlu1 %v1329_v35  ;;  %v1331_v37 = vpop.eup %1330 }
 0x273   : > { %v553_v39 = vmul.f32 %v1331_v37, %v552_v38 }
 0x2fa   : > { %563 = sbr.rel (%p1157_p4) target bundleno = 1036 (0x40c), region = 72 }
 0x2fb   : > { %v555_v40 = vpop.xlane.xlu1 %554 }
 0x2fc   : > { %v556_v41 = vadd.f32 %v555_v40, %v553_v39 }
 0x2fe   : > { %558 = vst.msk [vmem:[#allocation3] sm:$0xff] %vm415_vm1, %v556_v41 }
 0x2ff   : > { %v564_v42 = vld [vmem:[#allocation7] sm:$0xff]  ;;  %v1615_v43 = vmov 0   ;;  %v1616_v45 = vmov 0.0   ;;  %v573_v47 = vld [vmem:[#allocation6] sm:$0xff] }
 0x300   : > { %1332 = vset.pattern.permute.xlu0 %v1615_v43 }
 0x301   : > { %567 = vperm.xlu0 %1332, %v564_v42  }
 0x37c   : > { %v568_v44 = vpop.permute.xlu0 %567 }
 0x37d   : > { %vm570_vm3 = vcmp.gt.f32.partialorder %v536_v23, %v568_v44 }
 0x37e   : > { %v1158_v46 = vsel %vm570_vm3, 1.0, %v1616_v45 }
 0x37f   : > { %574 = vadd.xlane.f32.xlu0 %v1158_v46 }
 0x408   : > { %v575_v48 = vpop.xlane.xlu0 %574 }
 0x409   : > { %v576_v49 = vadd.f32 %v575_v48, %v573_v47 }
 0x40b   : > { %577 = vst.msk [vmem:[#allocation6] sm:$0xff] %vm415_vm1, %v576_v49 }
 0x40c PF: > { %p1159_p3 = scmp.ne.s32.totalorder %s1594_s24, 1 }
 0x40e   : > { %581 = sbr.rel (%p1159_p3) target bundleno = 1340 (0x53c), region = 76 }
 0x413   : > { %v582_v50 = vld [vmem:[#allocation14] sm:$0xff]  ;;  %v1617_v51 = vmov 2   ;;  %v1618_v52 = vmov 0   ;;  %v1619_v53 = vmov 3   ;;  %v1620_v54 = vmov 1   ;;  %v583_v63 = vld [vmem:[#allocation16] sm:$0xff] }
 0x414   : > { %1335 = vset.pattern.permute.xlu1 %v1617_v51  ;;  %1333 = vset.pattern.permute.xlu0 %v1618_v52  ;;  %v1621_v55 = vmov 4   ;;  %v1622_v56 = vmov 5   ;;  %v1623_v57 = vmov 6   ;;  %v1624_v58 = vmov 7   ;;  %v682_v52 = vld [vmem:[#allocation5] sm:$0xff] }
 0x415   : > { %608 = vperm.xlu1 %1335, %v582_v50   ;;  %586 = vperm.xlu0 %1333, %v582_v50   ;;  %v590_v59 = vshrl.u32 %v533_v17, 7  ;;  %v1625_v49 = vmov 0.0  }
 0x417   : > { %v591_v60 = vsub.s32 0, %v590_v59  ;;  %v613_v61 = vsub.s32 2, %v590_v59  ;;  %v602_v62 = vsub.s32 1, %v590_v59  ;;  %v624_v4 = vsub.s32 3, %v590_v59 }
 0x418   : > { %v635_v7 = vsub.s32 4, %v590_v59  ;;  %v646_v8 = vsub.s32 5, %v590_v59  ;;  %v657_v23 = vsub.s32 6, %v590_v59  ;;  %v668_v35 = vsub.s32 7, %v590_v59 }
 0x419   : > { %1336 = vset.pattern.permute.xlu1 %v1619_v53  ;;  %1334 = vset.pattern.permute.xlu0 %v1620_v54  ;;  %v592_v2 = vrot.slane %v583_v63, %v591_v60  ;;  %v614_v5 = vrot.slane %v583_v63, %v613_v61  ;;  %v603_v6 = vrot.slane %v583_v63, %v602_v62  ;;  %v676_v54 = vld [vmem:[#allocation4] sm:$0xff] }
 0x41a   : > { %619 = vperm.xlu1 %1336, %v582_v50   ;;  %597 = vperm.xlu0 %1334, %v582_v50   ;;  %v625_v10 = vrot.slane %v583_v63, %v624_v4  ;;  %v636_v15 = vrot.slane %v583_v63, %v635_v7  ;;  %v647_v16 = vrot.slane %v583_v63, %v646_v8 }
 0x41b   : > { %v658_v33 = vrot.slane %v583_v63, %v657_v23  ;;  %v669_v41 = vrot.slane %v583_v63, %v668_v35 }
 0x41e   : > { %1337 = vset.pattern.permute.xlu1 %v1621_v55  ;;  %1338 = vset.pattern.permute.xlu0 %v1622_v56 }
 0x41f   : > { %630 = vperm.xlu1 %1337, %v582_v50   ;;  %641 = vperm.xlu0 %1338, %v582_v50  }
 0x423   : > { %1339 = vset.pattern.permute.xlu1 %v1623_v57  ;;  %1341 = vset.pattern.permute.xlu0 %v1624_v58 }
 0x424   : > { %652 = vperm.xlu1 %1339, %v582_v50  }
 0x428   : > { %1340 = vset.pattern.permute.xlu1 %v1624_v58 }
 0x429   : > { %663 = vperm.xlu1 %1340, %v582_v50  }
 0x490   : > { %v609_v1 = vpop.permute.xlu1 %608  ;;  %v587_v3 = vpop.permute.xlu0 %586 }
 0x491   : > { %v593_v9 = vsub.f32 %v587_v3, %v592_v2  ;;  %v615_v13 = vsub.f32 %v609_v1, %v614_v5 }
 0x493   : > { %v594_v19 = vand.u32 2147483647, %v593_v9  ;;  %v616_v24 = vand.u32 2147483647, %v615_v13 }
 0x495   : > { %v620_v11 = vpop.permute.xlu1 %619  ;;  %v598_v12 = vpop.permute.xlu0 %597 }
 0x496   : > { %v604_v14 = vsub.f32 %v598_v12, %v603_v6  ;;  %v626_v21 = vsub.f32 %v620_v11, %v625_v10 }
 0x498   : > { %v605_v22 = vand.u32 2147483647, %v604_v14  ;;  %v627_v31 = vand.u32 2147483647, %v626_v21 }
 0x49a   : > { %v606_v25 = vadd.f32 %v605_v22, %v594_v19  ;;  %v631_v27 = vpop.permute.xlu1 %630  ;;  %v642_v28 = vpop.permute.xlu0 %641 }
 0x49b   : > { %v637_v29 = vsub.f32 %v631_v27, %v636_v15  ;;  %v648_v30 = vsub.f32 %v642_v28, %v647_v16 }
 0x49c   : > { %v617_v32 = vadd.f32 %v616_v24, %v606_v25 }
 0x49d   : > { %v638_v34 = vand.u32 2147483647, %v637_v29  ;;  %v649_v37 = vand.u32 2147483647, %v648_v30 }
 0x49e   : > { %v628_v36 = vadd.f32 %v627_v31, %v617_v32 }
 0x49f   : > { %v653_v38 = vpop.permute.xlu1 %652 }
 0x4a0   : > { %v639_v39 = vadd.f32 %v638_v34, %v628_v36  ;;  %v659_v40 = vsub.f32 %v653_v38, %v658_v33 }
 0x4a2   : > { %v650_v42 = vadd.f32 %v649_v37, %v639_v39  ;;  %v660_v43 = vand.u32 2147483647, %v659_v40 }
 0x4a4   : > { %v664_v44 = vpop.permute.xlu1 %663  ;;  %v661_v46 = vadd.f32 %v660_v43, %v650_v42 }
 0x4a5   : > { %v670_v45 = vsub.f32 %v664_v44, %v669_v41 }
 0x4a7   : > { %v671_v47 = vand.u32 2147483647, %v670_v45 }
 0x4a9   : > { %v672_v48 = vadd.f32 %v671_v47, %v661_v46 }
 0x4ab   : > { %vm673_vm4 = vcmp.lt.f32.partialorder %v672_v48, 9.0 }
 0x4ac   : > { %v1160_v50 = vsel %vm673_vm4, 1.0, %v1625_v49 }
 0x4ad   : > { %683 = vadd.xlane.f32.xlu1 %v1160_v50  ;;  %v677_v51 = vmul.f32 %v1160_v50, %v1881_v20 }
 0x4af   : > { %678 = vadd.xlane.f32.xlu0 %v677_v51 }
 0x536   : > { %v684_v53 = vpop.xlane.xlu1 %683 }
 0x537   : > { %v685_v55 = vadd.f32 %v684_v53, %v682_v52 }
 0x538   : > { %v679_v56 = vpop.xlane.xlu0 %678 }
 0x539   : > { %686 = vst.msk [vmem:[#allocation5] sm:$0xff] %vm415_vm1, %v685_v55  ;;  %v680_v57 = vadd.f32 %v679_v56, %v676_v54 }
 0x53b   : > { %681 = vst.msk [vmem:[#allocation4] sm:$0xff] %vm415_vm1, %v680_v57 }
 0x53c PF: > { %1342 = vset.pattern.permute.xlu0 %v1613_v26  ;;  %v845_v58 = vld [vmem:[#allocation3] sm:$0xff]  ;;  %1343 = vset.pattern.permute.xlu1 %v1613_v26  ;;  %v863_v20 = vld [vmem:[#allocation6] sm:$0xff]  ;;  %s1170_s20 = sshll.u32 %s1594_s24, 6  ;;  %s951_s11 = sshll.u32 %s400_s27, 4  ;;  %s952_s11 = int_to_ptr.vmem [resolvable:$true] %s951_s11 }
 0x53d   : > { %1344 = vlog2.f32 %v845_v58  ;;  %vm875_vm5 = vcmp.lt.f32.partialorder %v863_v20, 5.0  ;;  %vm864_vm6 = vcmp.lt.f32.partialorder %v863_v20, 1.0  ;;  %v844_v8 = vld [vmem:[#allocation2] sm:$0xff]  ;;  %s949_s18 = scalar_lea.hbm %s1982_s6, %s1170_s20  ;;  %s924_s19 = scalar_lea.sflag [#allocation19], %s1826_s9 }
 0x53e   : > { %v1166_v60 = vsel %vm875_vm5, 1.0, %v1611_v0  ;;  %v1165_v63 = vsel %vm864_vm6, 1.0, %v1611_v0  ;;  %s1484_s30 = scalar_lea.vmem %s952_s11, 64  ;;  %s1626_s13 = smov [#allocation18]  }
 0x53f   : > { %v878_v61 = vsel %vm415_vm1, %v1166_v60, 0.0  ;;  %v867_v2 = vsel %vm415_vm1, %v1165_v63, 0.0  ;;  %p1485_p7 = scmp.ne.s32.totalorder %s952_s11, %s1484_s30  ;;  %s1488_s15 = sshll.u32 %s1626_s13, 4  ;;  %s1489_s15 = int_to_ptr.vmem [resolvable:$false] %s1488_s15 }
 0x540   : > { %v850_v59 = vld [vmem:[#allocation5] sm:$0xff]  ;;  %v879_v62 = vrot.slane %v878_v61, 4  ;;  %v868_v5 = vrot.slane %v867_v2, 4  ;;  %s1490_s23 = scalar_lea.vmem %s1489_s15, 128  ;;  %p1491_p9 = scmp.lt.s32.totalorder %s952_s11, %s1489_s15 }
 0x541   : > { %1346 = vrcp.f32 %v850_v59  ;;  %p1486_p2 = pnand %p1485_p7, %p1748_p10  ;;  %p1492_p5 = scmp.lt.s32.totalorder %s1490_s23, %s1484_s30 }
 0x542   : > { %v880_v1 = vadd.f32 %v879_v62, %v878_v61  ;;  %v849_v26 = vld [vmem:[#allocation4] sm:$0xff]  ;;  %v869_v13 = vadd.f32 %v868_v5, %v867_v2 }
 0x543   : > { %p1487_p11 = pneg %p1486_p2  ;;  %p1493_p0 = por %p1492_p5, %p1491_p9 }
 0x544   : > { %v881_v3 = vrot.slane %v880_v1, 2  ;;  %v870_v0 = vrot.slane %v869_v13, 2 }
 0x545   : > { %p1494_p1 = pnand %p1493_p0, %p1487_p11 }
 0x546   : > { %v882_v4 = vadd.f32 %v881_v3, %v880_v1  ;;  %v871_v23 = vadd.f32 %v870_v0, %v869_v13 }
 0x548   : > { %v883_v6 = vrot.slane %v882_v4, 1  ;;  %v872_v27 = vrot.slane %v871_v23, 1 }
 0x54a   : > { %v1345_v7 = vpop.eup %1344  ;;  %v884_v11 = vadd.f32 %v883_v6, %v882_v4  ;;  %v873_v30 = vadd.f32 %v872_v27, %v871_v23 }
 0x54b   : > { %v847_v10 = vmul.f32 0.6931472, %v1345_v7 }
 0x54c   : > { %v885_v15 = vmul.f32 0.125, %v884_v11  ;;  %v874_v32 = vmul.f32 0.125, %v873_v30 }
 0x54d   : > { %v848_v14 = vadd.f32 %v847_v10, %v844_v8 }
 0x54e   : > { %v1347_v9 = vpop.eup %1346  ;;  %912 = vperm.xlu1 %1343, %v885_v15  }
 0x54f   : > { %v852_v12 = vmul.f32 %v1347_v9, %v849_v26 }
 0x551   : > { %v853_v16 = vsub.f32 %v848_v14, %v852_v12 }
 0x553   : > { %v855_v19 = vsel %vm415_vm1, %v853_v16, 0.0 }
 0x554   : > { %v856_v21 = vrot.slane %v855_v19, 4 }
 0x556   : > { %v857_v22 = vadd.f32 %v856_v21, %v855_v19 }
 0x558   : > { %v858_v24 = vrot.slane %v857_v22, 2 }
 0x55a   : > { %v859_v25 = vadd.f32 %v858_v24, %v857_v22 }
 0x55c   : > { %v860_v28 = vrot.slane %v859_v25, 1 }
 0x55e   : > { %v861_v29 = vadd.f32 %v860_v28, %v859_v25 }
 0x560   : > { %v862_v31 = vmul.f32 0.125, %v861_v29 }
 0x562   : > { %895 = vperm.xlu0 %1342, %v862_v31  }
 0x566   : > { %903 = vperm.xlu0 %1342, %v874_v32  }
 0x567   : > { %1497 = shalt.err (!%p1494_p1)
}
 0x568   : > { %s1498_s16 = scalar_lea.hbm %s949_s18, 64  ;;  %s1502_s8 = scalar_lea.hbm %s1982_s6, 128 }
 0x569   : > { %p1499_p13 = scmp.ne.s32.totalorder %s949_s18, %s1498_s16  ;;  %p1503_p4 = scmp.lt.s32.totalorder %s949_s18, %s1982_s6 }
 0x56a   : > { %p1504_p3 = scmp.lt.s32.totalorder %s1502_s8, %s1498_s16 }
 0x56b   : > { %p1500_p8 = pnand %p1499_p13, %p1748_p10 }
 0x56c   : > { %p1505_p7 = por %p1504_p3, %p1503_p4 }
 0x56d   : > { %p1501_p12 = pneg %p1500_p8 }
 0x56f   : > { %p1506_p2 = pnand %p1505_p7, %p1501_p12 }
 0x571   : > { %1509 = shalt.err (!%p1506_p2)
}
 0x572   : > { %1218 = dma.vmem_to_hbm [thread:$0]  (%p1748_p10), %s952_s11, 64, %s949_s18, %s924_s19   ;;  %v889_v33 = vshrl.u32 %v533_v17, 7  ;;  %vm891_vm8 = vcmp.eq.s32.totalorder %v1878_v18, 0  ;;  %vm899_vm9 = vcmp.eq.s32.totalorder %v1878_v18, 1  ;;  %vm908_vm10 = vcmp.eq.s32.totalorder %v1878_v18, 2 }
 0x573   : > { %s1169_s3 = sshll.u32 %s1594_s24, 7  ;;  %s937_s26 = sshll.u32 %s1895_s29, 4  ;;  %s938_s26 = int_to_ptr.vmem [resolvable:$true] %s937_s26 }
 0x574   : > { %vm890_vm7 = vcmp.eq.s32.totalorder %v889_v33, 0  ;;  %s935_s11 = scalar_lea.hbm %s1981_s5, %s1169_s3  ;;  %s919_s28 = scalar_lea.sflag [#allocation10], %s1826_s9 }
 0x575   : > { %vm892_vm11 = vmand %vm890_vm7, %vm891_vm8  ;;  %s1510_s1 = scalar_lea.vmem %s938_s26, 128  ;;  %s1627_s18 = smov [#allocation17]  }
 0x576   : > { %vm900_vm12 = vmand %vm890_vm7, %vm899_vm9  ;;  %p1511_p11 = scmp.ne.s32.totalorder %s938_s26, %s1510_s1  ;;  %s1514_s19 = sshll.u32 %s1627_s18, 4  ;;  %s1515_s19 = int_to_ptr.vmem [resolvable:$false] %s1514_s19 }
 0x577   : > { %vm909_vm13 = vmand %vm890_vm7, %vm908_vm10  ;;  %s1516_s30 = scalar_lea.vmem %s1515_s19, 256  ;;  %p1517_p0 = scmp.lt.s32.totalorder %s938_s26, %s1515_s19 }
 0x578   : > { %p1512_p9 = pnand %p1511_p11, %p1748_p10  ;;  %p1518_p1 = scmp.lt.s32.totalorder %s1516_s30, %s1510_s1 }
 0x57a   : > { %p1513_p5 = pneg %p1512_p9  ;;  %p1519_p13 = por %p1518_p1, %p1517_p0 }
 0x57c   : > { %p1520_p8 = pnand %p1519_p13, %p1513_p5 }
 0x5c9   : > { %v913_v35 = vpop.permute.xlu1 %912 }
 0x5ca   : > { %v915_v39 = vsel %vm909_vm13, %v913_v35, 0.0 }
 0x5dd   : > { %v896_v34 = vpop.permute.xlu0 %895 }
 0x5de   : > { %v898_v37 = vsel %vm892_vm11, %v896_v34, 0.0 }
 0x5e1   : > { %v904_v36 = vpop.permute.xlu0 %903 }
 0x5e2   : > { %v906_v38 = vsel %vm900_vm12, %v904_v36, 0.0 }
 0x5e3   : > { %v907_v17 = vadd.f32 %v906_v38, %v898_v37 }
 0x5e5   : > { %v916_v40 = vadd.f32 %v915_v39, %v907_v17 }
 0x5e7   : > { %917 = vst [vmem:[%s1895_s29] sm:$0xff] %v916_v40 }
 0x5e8   : > { %1523 = shalt.err (!%p1520_p8)
}
 0x5e9   : > { %s1524_s24 = scalar_lea.hbm %s935_s11, 128  ;;  %s1528_s13 = scalar_lea.hbm %s1981_s5, 256 }
 0x5ea   : > { %p1525_p12 = scmp.ne.s32.totalorder %s935_s11, %s1524_s24  ;;  %p1529_p7 = scmp.lt.s32.totalorder %s935_s11, %s1981_s5 }
 0x5eb   : > { %p1530_p2 = scmp.lt.s32.totalorder %s1528_s13, %s1524_s24 }
 0x5ec   : > { %p1526_p4 = pnand %p1525_p12, %p1748_p10 }
 0x5ed   : > { %p1531_p11 = por %p1530_p2, %p1529_p7 }
 0x5ee   : > { %p1527_p3 = pneg %p1526_p4 }
 0x5f0   : > { %p1532_p9 = pnand %p1531_p11, %p1527_p3 }
 0x5f2   : > { %1535 = shalt.err (!%p1532_p9)
}
 0x5f3   : > { %1217 = dma.vmem_to_hbm [thread:$0]  (%p1748_p10), %s938_s26, 128, %s935_s11, %s919_s28  }
 0x5f4 PF: > { %s2015_s10 = sld [smem:[#allocation26_spill]]  ;;  %s963_s7 = sand.u32 1, %s1582_s21  }
 0x5f5   : > { %s964_s8 = scalar_lea.sflag [#allocation10], %s963_s7 }
 0x5fa   : > { %p2016_p5 = scmp.ge.s32.totalorder %s2015_s10, 2 }
 0x5fc   : > { %p1239_p0 = pnand %p2016_p5, %p1708_p6 }
 0x5fe   : > { %p1240_p1 = pneg %p1239_p0 }
 0x600   : > { %1573 = dma.done.wait (%p1240_p1), %s964_s8, 128  }
 0x601   : > { %1575 = vsyncadd (%p1240_p1), %s964_s8, 4294967168  ;;  %s973_s12 = scalar_lea.sflag [#allocation19], %s963_s7 }
 0x602   : > { %1577 = dma.done.wait (%p1240_p1), %s973_s12, 64  }
 0x603   : > { %1579 = vsyncadd (%p1240_p1), %s973_s12, 4294967232  ;;  %s30_s26 = sadd.s32 1, %s2015_s10   ;;  %s2017_s17 = sld [smem:[#allocation25_spill]] }
 0x604   : > { %p27_p13 = scmp.ge.s32.totalorder %s30_s26, 4   ;;  %s2018_s23 = sld [smem:[#allocation29_spill]] }
 0x605   : > { %s2019_s14 = sld [smem:[#allocation28_spill]]  ;;  %s2020_s21 = smov %s1586_s22 }
 0x606   : > { %s2022_s24 = smov %s1598_s25 }
 0x607   :  { %29 = sbr.rel (!%p27_p13) target bundleno = 14 (0xe), region = 167 }
 0x609   : > { %s2021_s22 = smov %s2017_s17 }
 0x60b   : > { %s2023_s25 = smov %s2019_s14 }
 0x60c   :  { %978 = vsyncpa [#allocation9], 1 }
 0x60d   :  { %980 = vsyncpa [#allocation9 + $0x1], 1 }
 0x60e   :  { %981 = vsyncpa [#allocation12], 1 }
 0x60f   :  { %983 = vsyncpa [#allocation12 + $0x1], 1 }
 0x610   :  { %984 = vsyncpa [#allocation15], 1 }
 0x611   :  { %985 = vsyncpa [#allocation10], 1 }
 0x612   :  { %987 = vsyncpa [#allocation10 + $0x1], 1 }
 0x613   :  { %988 = vsyncpa [#allocation19], 1 }
 0x614   :  { %990 = vsyncpa [#allocation19 + $0x1], 1 }

</bundles_post_ra>
